<compile_context>
chip_gen: v7x
topology: tpu7x:2x2x1
jax: 0.10.0
libtpu: 0.0.40
codegen_flags: <defaults>
</compile_context>

<pallas_src>
import functools

import jax
import jax.numpy as jnp
from jax.experimental import pallas as pl
from jax.experimental.pallas import tpu as pltpu

GSEG = 128    # lane segment per LSTM gate (whole-vreg gate views)
MLP_W = 64    # MLP hidden width (linear1 / linear2 out_features)
TH = 5        # linear3 out_features == trace_length * hidden_units

# ---- Pack-A row offsets (128-lane "main" pack: MLP + dueling head + biases). ----
RA_W1 = 0          # 8 rows  : W1^T (7x64)  in cols [0,64)
RA_W2 = 8          # 64 rows : W2^T (64x64) in cols [0,64)
RA_W3 = 72         # 64 rows : W3^T (64x5)  in cols [0,5)
RA_WHEAD = 136     # 8 rows  : [W_adv^T | W_val^T] in cols [0,OUT] (rows [0,H) real)
RA_B1 = 144        # b1 in lanes [0,64)
RA_B2 = 145        # b2 in lanes [0,64)
RA_B3 = 146        # b3 in lanes [0,5)
RA_BHEAD = 147     # lanes [0,OUT) = b_adv, lane OUT = b_val
RA_VMASK = 148     # one-hot 1.0 at lane OUT
RA_ROWS = 152

# ---- Pack-B row offsets (512-lane LSTM pack, gate g in lanes [g*128, g*128+H)). --
RB_WIH = 0         # 8 rows  : W_ih^T, i/f/o columns pre-scaled by 0.5
RB_WHH = 8         # 8 rows  : W_hh^T rows, i/f/o columns pre-scaled by 0.5
RB_BIAS = 16       # 1 row   : b_ih + b_hh, i/f/o lanes pre-scaled by 0.5
RB_ROWS = 24


def meta_learner_kernel(acts_ref, pa_ref, pb_ref, out_ref, gx_scr, out_scr,
                        *, N, H, OUT):
    f32 = jnp.float32

    # ---- MLP: state(7) -> relu(64) -> relu(64) -> relu(5), lane-padded to 128. ---
    state = acts_ref[0:N, :]                                       # (N,128) lane-dense load
    x = jnp.maximum(jnp.dot(state[:, 0:8], pa_ref[RA_W1:RA_W1 + 8, :],
                            preferred_element_type=f32) + pa_ref[RA_B1:RA_B1 + 1, :], 0.0)
    x = jnp.maximum(jnp.dot(x[:, 0:MLP_W], pa_ref[RA_W2:RA_W2 + MLP_W, :],
                            preferred_element_type=f32) + pa_ref[RA_B2:RA_B2 + 1, :], 0.0)
    x = jnp.maximum(jnp.dot(x[:, 0:MLP_W], pa_ref[RA_W3:RA_W3 + MLP_W, :],
                            preferred_element_type=f32) + pa_ref[RA_B3:RA_B3 + 1, :], 0.0)
    # x lanes [TH,128) are exactly zero by construction of the packing.

    # ---- Hoisted LSTM input projection for ALL N steps -> VMEM scratch. ----------
    # (i/f/o columns and bias lanes are pre-scaled by 0.5 host-side, so that
    #  sigmoid(z) == 0.5*tanh(z/2) + 0.5 needs no per-step pre-multiply.)
    gx_scr[...] = jnp.dot(x[:, 0:8], pb_ref[RB_WIH:RB_WIH + 8, :],
                          preferred_element_type=f32) + pb_ref[RB_BIAS:RB_BIAS + 1, :]

    h = acts_ref[N:N + 1, :]          # (1,128); lanes [H,128) are zero
    c = acts_ref[N + 1:N + 2, :]      # (1,128); lanes [H,128) are zero

    # ---- LSTM recurrence, fully unrolled (N is a compile-time constant). ---------
    # gx rows and W_hh rows are (re)loaded from VMEM inside the loop so nothing
    # large stays live in vregs across the unroll.
    for t in range(N):
        gates = gx_scr[t:t + 1, :]                                 # (1, 4*GSEG)
        # h @ W_hh as H broadcast MACs, combined with a balanced tree add.
        p = [h[:, k:k + 1] * pb_ref[RB_WHH + k:RB_WHH + k + 1, :] for k in range(H)]
        gates = (gates + p[0]) + ((p[1] + p[2]) + (p[3] + p[4]))
        tg = jnp.tanh(gates)                                       # one EUP pass, all 4 gates
        i_g = 0.5 * tg[:, 0:GSEG] + 0.5                            # == sigmoid(pre-activation)
        f_g = 0.5 * tg[:, GSEG:2 * GSEG] + 0.5
        g_g = tg[:, 2 * GSEG:3 * GSEG]
        o_g = 0.5 * tg[:, 3 * GSEG:4 * GSEG] + 0.5
        c = f_g * c + i_g * g_g
        h = o_g * jnp.tanh(c)
        out_scr[t:t + 1, :] = h       # the only store inside the loop

    # ---- Fused dueling head: single MXU matmul computes [adv | val]. -------------
    out_block = out_scr[...]                                       # (N,128); lanes [H,128) zero
    comb = jnp.dot(out_block[:, 0:8], pa_ref[RA_WHEAD:RA_WHEAD + 8, :],
                   preferred_element_type=f32) + pa_ref[RA_BHEAD:RA_BHEAD + 1, :]
    row_sum = jnp.sum(comb, axis=1, keepdims=True)                 # sum(adv) + val
    val_col = jnp.sum(comb * pa_ref[RA_VMASK:RA_VMASK + 1, :], axis=1, keepdims=True)
    adv_mean = (row_sum - val_col) * (1.0 / OUT)
    out_ref[0:N, :] = comb + (val_col - adv_mean)                  # lanes [0,OUT) are valid
    out_ref[N:N + 1, :] = h
    out_ref[N + 1:N + 2, :] = c


def pack_params(params, *, hidden_units, output_shape):
    """Host-side packing of all weights/biases into 2 lane-dense buffers.

    Call ONCE per parameter set and cache the result across forward calls.
    """
    H, OUT = hidden_units, output_shape
    f32 = jnp.float32
    t = lambda w: jnp.asarray(w, f32).T

    # --- Pack A (RA_ROWS, 128): MLP weights, fused dueling head, biases, mask. ---
    pack_a = jnp.zeros((RA_ROWS, GSEG), f32)
    pack_a = pack_a.at[RA_W1:RA_W1 + 7, 0:MLP_W].set(t(params["w1"]))
    pack_a = pack_a.at[RA_W2:RA_W2 + MLP_W, 0:MLP_W].set(t(params["w2"]))
    pack_a = pack_a.at[RA_W3:RA_W3 + MLP_W, 0:TH].set(t(params["w3"]))
    pack_a = pack_a.at[RA_WHEAD:RA_WHEAD + H, 0:OUT].set(t(params["w_adv"]))
    pack_a = pack_a.at[RA_WHEAD:RA_WHEAD + H, OUT:OUT + 1].set(t(params["w_val"]))
    pack_a = pack_a.at[RA_B1, 0:MLP_W].set(jnp.asarray(params["b1"], f32))
    pack_a = pack_a.at[RA_B2, 0:MLP_W].set(jnp.asarray(params["b2"], f32))
    pack_a = pack_a.at[RA_B3, 0:TH].set(jnp.asarray(params["b3"], f32))
    pack_a = pack_a.at[RA_BHEAD, 0:OUT].set(jnp.asarray(params["b_adv"], f32))
    pack_a = pack_a.at[RA_BHEAD, OUT].set(jnp.asarray(params["b_val"], f32)[0])
    pack_a = pack_a.at[RA_VMASK, OUT].set(1.0)

    # --- Pack B (RB_ROWS, 512): gate g lives in lanes [g*128, g*128+H).          ---
    # sigmoid(z) = 0.5*tanh(z/2) + 0.5  ->  fold the 0.5 pre-scale of z into the
    # i, f, o gate columns (and bias lanes); the g gate stays unscaled (plain tanh).
    wiht, whht = t(params["w_ih"]), t(params["w_hh"])              # (H, 4H), gate order i,f,g,o
    bsum = jnp.asarray(params["b_ih"], f32) + jnp.asarray(params["b_hh"], f32)
    gate_scale = (0.5, 0.5, 1.0, 0.5)
    pack_b = jnp.zeros((RB_ROWS, 4 * GSEG), f32)
    for g in range(4):
        lo, s = g * GSEG, gate_scale[g]
        pack_b = pack_b.at[RB_WIH:RB_WIH + H, lo:lo + H].set(s * wiht[:, g * H:(g + 1) * H])
        pack_b = pack_b.at[RB_WHH:RB_WHH + H, lo:lo + H].set(s * whht[:, g * H:(g + 1) * H])
        pack_b = pack_b.at[RB_BIAS, lo:lo + H].set(s * bsum[g * H:(g + 1) * H])
    return pack_a, pack_b


@functools.partial(jax.jit, static_argnames=("trace_length", "hidden_units", "output_shape"))
def meta_learner_forward_packed(state, hidden_state, cell_state, pack_a, pack_b, *,
                                trace_length, hidden_units, output_shape):
    """Jitted forward taking pre-packed parameters (pack once, reuse every call)."""
    T, H, OUT = trace_length, hidden_units, output_shape
    assert T * H == TH, "trace_length * hidden_units must equal linear3 out_features (5)"
    # TODO(synk): the trace_length > 1 (hidden_units == 1) configuration needs a per-step
    # row->column reshape of the MLP output and is not implemented in this optimized kernel.
    assert T == 1, "optimized kernel implements the trace_length == 1 configuration"
    N = state.shape[0]

    # Single fused activation input: rows [0,N) = state (7 real lanes), row N = h0,
    # row N+1 = c0 (both at lanes [0,H)).  One lane-dense DMA instead of two.
    acts = jnp.zeros((N + 2, GSEG), jnp.float32)
    acts = acts.at[0:N, 0:7].set(jnp.asarray(state, jnp.float32))
    acts = acts.at[N, 0:H].set(jnp.asarray(hidden_state, jnp.float32).reshape(H))
    acts = acts.at[N + 1, 0:H].set(jnp.asarray(cell_state, jnp.float32).reshape(H))

    vmem = pl.BlockSpec(memory_space=pltpu.MemorySpace.VMEM)
    kernel = functools.partial(meta_learner_kernel, N=N, H=H, OUT=OUT)

    # Single fused output: rows [0,N) = lane-padded model_out, row N = hidden,
    # row N+1 = cell.  3 input DMAs + 1 output DMA total.
    fused = pl.pallas_call(
        kernel,
        out_shape=jax.ShapeDtypeStruct((N + 2, GSEG), jnp.float32),
        in_specs=[vmem, vmem, vmem],
        out_specs=vmem,
        scratch_shapes=[
            pltpu.VMEM((N, 4 * GSEG), jnp.float32),   # gx: hoisted LSTM input projection
            pltpu.VMEM((N, GSEG), jnp.float32),       # per-step LSTM outputs
        ],
    )(acts, pack_a, pack_b)

    model_out = fused[0:N, 0:OUT]
    hidden = fused[N, 0:H].reshape(1, T, H)
    cell = fused[N + 1, 0:H].reshape(1, T, H)
    return model_out, hidden, cell


def meta_learner_forward(state, hidden_state, cell_state, params, *,
                         trace_length, hidden_units, output_shape):
    """Convenience wrapper (packs every call). Prefer pack_params + *_packed in loops."""
    pack_a, pack_b = pack_params(params, hidden_units=hidden_units, output_shape=output_shape)
    return meta_learner_forward_packed(
        state, hidden_state, cell_state, pack_a, pack_b,
        trace_length=trace_length, hidden_units=hidden_units, output_shape=output_shape)


# ---------------- pure-JAX reference (mirrors the PyTorch forward) ----------------
def reference_forward(state, hidden_state, cell_state, params, *,
                      trace_length, hidden_units, output_shape):
    T, H = trace_length, hidden_units
    x = jax.nn.relu(state @ params["w1"].T + params["b1"])
    x = jax.nn.relu(x @ params["w2"].T + params["b2"])
    x = jax.nn.relu(x @ params["w3"].T + params["b3"])
    seq = x.reshape(x.shape[0], T, H)
    h = hidden_state[0]
    c = cell_state[0]
    outs = []
    for t in range(x.shape[0]):
        gates = seq[t] @ params["w_ih"].T + params["b_ih"] + h @ params["w_hh"].T + params["b_hh"]
        i = jax.nn.sigmoid(gates[:, :H])
        f = jax.nn.sigmoid(gates[:, H:2 * H])
        g = jnp.tanh(gates[:, 2 * H:3 * H])
        o = jax.nn.sigmoid(gates[:, 3 * H:])
        c = f * c + i * g
        h = o * jnp.tanh(c)
        outs.append(h[T - 1])
    out = jnp.stack(outs)
    adv = out @ params["w_adv"].T + params["b_adv"]
    val = out @ params["w_val"].T + params["b_val"]
    model_out = val + adv - adv.mean(axis=1, keepdims=True)
    return model_out, h[None], c[None]


def init_params(key, hidden_units, output_shape):
    """Deterministic PyTorch-style uniform(-1/sqrt(fan_in)) init."""
    H = hidden_units

    def lin(k, out_f, in_f):
        k1, k2 = jax.random.split(k)
        bound = 1.0 / jnp.sqrt(in_f)
        w = jax.random.uniform(k1, (out_f, in_f), jnp.float32, -bound, bound)
        b = jax.random.uniform(k2, (out_f,), jnp.float32, -bound, bound)
        return w, b

    keys = jax.random.split(key, 7)
    w1, b1 = lin(keys[0], 64, 7)
    w2, b2 = lin(keys[1], 64, 64)
    w3, b3 = lin(keys[2], 5, 64)
    w_ih, b_ih = lin(keys[3], 4 * H, H)     # LSTM input->hidden, gate order i,f,g,o
    w_hh, b_hh = lin(keys[4], 4 * H, H)     # LSTM hidden->hidden
    w_adv, b_adv = lin(keys[5], output_shape, H)
    w_val, b_val = lin(keys[6], 1, H)
    return dict(w1=w1, b1=b1, w2=w2, b2=b2, w3=w3, b3=b3,
                w_ih=w_ih, b_ih=b_ih, w_hh=w_hh, b_hh=b_hh,
                w_adv=w_adv, b_adv=b_adv, w_val=w_val, b_val=b_val)


if __name__ == "__main__":
    trace_length = 1
    hidden_units = 5          # trace_length * hidden_units == 5 (linear3 out features)
    output_shape = 4
    N = 8                     # batch / LSTM sequence length

    key = jax.random.PRNGKey(0)
    k_state, k_h, k_c, k_params = jax.random.split(key, 4)

    state = jax.random.normal(k_state, (N, 7), jnp.float32)
    hidden_state = 0.1 * jax.random.normal(k_h, (1, trace_length, hidden_units), jnp.float32)
    cell_state = 0.1 * jax.random.normal(k_c, (1, trace_length, hidden_units), jnp.float32)
    params = init_params(k_params, hidden_units, output_shape)

    # Pack parameters ONCE; reuse the packed buffers for every forward call.
    pack_a, pack_b = pack_params(params, hidden_units=hidden_units, output_shape=output_shape)

    model_out, hidden, cell = meta_learner_forward_packed(
        state, hidden_state, cell_state, pack_a, pack_b,
        trace_length=trace_length, hidden_units=hidden_units, output_shape=output_shape)
    jax.block_until_ready((model_out, hidden, cell))

    ref_out, ref_h, ref_c = reference_forward(
        state, hidden_state, cell_state, params,
        trace_length=trace_length, hidden_units=hidden_units, output_shape=output_shape)

    assert model_out.shape == (N, output_shape)
    assert hidden.shape == (1, trace_length, hidden_units)
    assert cell.shape == (1, trace_length, hidden_units)
    assert jnp.allclose(model_out, ref_out, rtol=1e-4, atol=1e-4)
    assert jnp.allclose(hidden, ref_h, rtol=1e-4, atol=1e-4)
    assert jnp.allclose(cell, ref_c, rtol=1e-4, atol=1e-4)

    print("KERNEL_OK")
</pallas_src>

<mosaic_0001>
module attributes {stable_mosaic.version = 11 : i64} {
  func.func @meta_learner_kernel(%arg0: memref<10x128xf32, #tpu.memory_space<vmem>>, %arg1: memref<152x128xf32, #tpu.memory_space<vmem>>, %arg2: memref<24x512xf32, #tpu.memory_space<vmem>>, %arg3: memref<10x128xf32, #tpu.memory_space<vmem>>, %arg4: memref<8x512xf32, #tpu.memory_space<vmem>>, %arg5: memref<8x128xf32, #tpu.memory_space<vmem>>) attributes {dimension_semantics = [], scalar_prefetch = 0 : i64, scratch_operands = 2 : i64, tpu.core_type = #tpu.core_type<tc>} {
    %c0 = arith.constant 0 : index
    %c0_0 = arith.constant 0 : index
    %0 = vector.load %arg0[%c0, %c0_0] : memref<10x128xf32, #tpu.memory_space<vmem>>, vector<8x128xf32>
    %1 = vector.extract_strided_slice %0 {offsets = [0, 0], sizes = [8, 8], strides = [1, 1]} : vector<8x128xf32> to vector<8x8xf32>
    %c0_1 = arith.constant 0 : index
    %c0_2 = arith.constant 0 : index
    %2 = vector.load %arg1[%c0_1, %c0_2] : memref<152x128xf32, #tpu.memory_space<vmem>>, vector<8x128xf32>
    %cst = arith.constant dense<0.000000e+00> : vector<8x128xf32>
    %3 = tpu.matmul %1, %2, %cst {dimension_numbers = #tpu.dot_dimension_numbers<[1], [0], [0], [1], [0, 0, 1, 1], [], []>} : vector<8x8xf32>, vector<8x128xf32>, vector<8x128xf32> -> vector<8x128xf32>
    %c144 = arith.constant 144 : index
    %c0_3 = arith.constant 0 : index
    %4 = vector.load %arg1[%c144, %c0_3] : memref<152x128xf32, #tpu.memory_space<vmem>>, vector<1x128xf32>
    %5 = vector.broadcast %4 : vector<1x128xf32> to vector<8x128xf32>
    %6 = arith.addf %3, %5 : vector<8x128xf32>
    %cst_4 = arith.constant 0.000000e+00 : f32
    %7 = vector.broadcast %cst_4 : f32 to vector<8x128xf32>
    %8 = arith.maximumf %6, %7 : vector<8x128xf32>
    %9 = vector.extract_strided_slice %8 {offsets = [0, 0], sizes = [8, 64], strides = [1, 1]} : vector<8x128xf32> to vector<8x64xf32>
    %c8 = arith.constant 8 : index
    %c0_5 = arith.constant 0 : index
    %10 = vector.load %arg1[%c8, %c0_5] : memref<152x128xf32, #tpu.memory_space<vmem>>, vector<64x128xf32>
    %cst_6 = arith.constant dense<0.000000e+00> : vector<8x128xf32>
    %11 = tpu.matmul %9, %10, %cst_6 {dimension_numbers = #tpu.dot_dimension_numbers<[1], [0], [0], [1], [0, 0, 1, 1], [], []>} : vector<8x64xf32>, vector<64x128xf32>, vector<8x128xf32> -> vector<8x128xf32>
    %c145 = arith.constant 145 : index
    %c0_7 = arith.constant 0 : index
    %12 = vector.load %arg1[%c145, %c0_7] : memref<152x128xf32, #tpu.memory_space<vmem>>, vector<1x128xf32>
    %13 = vector.broadcast %12 : vector<1x128xf32> to vector<8x128xf32>
    %14 = arith.addf %11, %13 : vector<8x128xf32>
    %cst_8 = arith.constant 0.000000e+00 : f32
    %15 = vector.broadcast %cst_8 : f32 to vector<8x128xf32>
    %16 = arith.maximumf %14, %15 : vector<8x128xf32>
    %17 = vector.extract_strided_slice %16 {offsets = [0, 0], sizes = [8, 64], strides = [1, 1]} : vector<8x128xf32> to vector<8x64xf32>
    %c72 = arith.constant 72 : index
    %c0_9 = arith.constant 0 : index
    %18 = vector.load %arg1[%c72, %c0_9] : memref<152x128xf32, #tpu.memory_space<vmem>>, vector<64x128xf32>
    %cst_10 = arith.constant dense<0.000000e+00> : vector<8x128xf32>
    %19 = tpu.matmul %17, %18, %cst_10 {dimension_numbers = #tpu.dot_dimension_numbers<[1], [0], [0], [1], [0, 0, 1, 1], [], []>} : vector<8x64xf32>, vector<64x128xf32>, vector<8x128xf32> -> vector<8x128xf32>
    %c146 = arith.constant 146 : index
    %c0_11 = arith.constant 0 : index
    %20 = vector.load %arg1[%c146, %c0_11] : memref<152x128xf32, #tpu.memory_space<vmem>>, vector<1x128xf32>
    %21 = vector.broadcast %20 : vector<1x128xf32> to vector<8x128xf32>
    %22 = arith.addf %19, %21 : vector<8x128xf32>
    %cst_12 = arith.constant 0.000000e+00 : f32
    %23 = vector.broadcast %cst_12 : f32 to vector<8x128xf32>
    %24 = arith.maximumf %22, %23 : vector<8x128xf32>
    %25 = vector.extract_strided_slice %24 {offsets = [0, 0], sizes = [8, 8], strides = [1, 1]} : vector<8x128xf32> to vector<8x8xf32>
    %c0_13 = arith.constant 0 : index
    %c0_14 = arith.constant 0 : index
    %26 = vector.load %arg2[%c0_13, %c0_14] : memref<24x512xf32, #tpu.memory_space<vmem>>, vector<8x512xf32>
    %cst_15 = arith.constant dense<0.000000e+00> : vector<8x512xf32>
    %27 = tpu.matmul %25, %26, %cst_15 {dimension_numbers = #tpu.dot_dimension_numbers<[1], [0], [0], [1], [0, 0, 1, 1], [], []>} : vector<8x8xf32>, vector<8x512xf32>, vector<8x512xf32> -> vector<8x512xf32>
    %c16 = arith.constant 16 : index
    %c0_16 = arith.constant 0 : index
    %28 = vector.load %arg2[%c16, %c0_16] : memref<24x512xf32, #tpu.memory_space<vmem>>, vector<1x512xf32>
    %29 = vector.broadcast %28 : vector<1x512xf32> to vector<8x512xf32>
    %30 = arith.addf %27, %29 : vector<8x512xf32>
    %c0_17 = arith.constant 0 : index
    %c0_18 = arith.constant 0 : index
    %31 = vector.load %arg4[%c0_17, %c0_18] : memref<8x512xf32, #tpu.memory_space<vmem>>, vector<8x512xf32>
    tpu.vector_store %arg4[%c0_17, %c0_18], %30 {strides = array<i32>} : memref<8x512xf32, #tpu.memory_space<vmem>>, vector<8x512xf32>,
    %c8_19 = arith.constant 8 : index
    %c0_20 = arith.constant 0 : index
    %32 = vector.load %arg0[%c8_19, %c0_20] : memref<10x128xf32, #tpu.memory_space<vmem>>, vector<1x128xf32>
    %c9 = arith.constant 9 : index
    %c0_21 = arith.constant 0 : index
    %33 = vector.load %arg0[%c9, %c0_21] : memref<10x128xf32, #tpu.memory_space<vmem>>, vector<1x128xf32>
    %c0_22 = arith.constant 0 : index
    %c0_23 = arith.constant 0 : index
    %34 = vector.load %arg4[%c0_22, %c0_23] : memref<8x512xf32, #tpu.memory_space<vmem>>, vector<1x512xf32>
    %35 = vector.extract_strided_slice %32 {offsets = [0, 0], sizes = [1, 1], strides = [1, 1]} : vector<1x128xf32> to vector<1x1xf32>
    %c8_24 = arith.constant 8 : index
    %c0_25 = arith.constant 0 : index
    %36 = vector.load %arg2[%c8_24, %c0_25] : memref<24x512xf32, #tpu.memory_space<vmem>>, vector<1x512xf32>
    %37 = vector.broadcast %35 : vector<1x1xf32> to vector<1x512xf32>
    %38 = arith.mulf %37, %36 : vector<1x512xf32>
    %39 = vector.extract_strided_slice %32 {offsets = [0, 1], sizes = [1, 1], strides = [1, 1]} : vector<1x128xf32> to vector<1x1xf32>
    %c9_26 = arith.constant 9 : index
    %c0_27 = arith.constant 0 : index
    %40 = vector.load %arg2[%c9_26, %c0_27] : memref<24x512xf32, #tpu.memory_space<vmem>>, vector<1x512xf32>
    %41 = vector.broadcast %39 : vector<1x1xf32> to vector<1x512xf32>
    %42 = arith.mulf %41, %40 : vector<1x512xf32>
    %43 = vector.extract_strided_slice %32 {offsets = [0, 2], sizes = [1, 1], strides = [1, 1]} : vector<1x128xf32> to vector<1x1xf32>
    %c10 = arith.constant 10 : index
    %c0_28 = arith.constant 0 : index
    %44 = vector.load %arg2[%c10, %c0_28] : memref<24x512xf32, #tpu.memory_space<vmem>>, vector<1x512xf32>
    %45 = vector.broadcast %43 : vector<1x1xf32> to vector<1x512xf32>
    %46 = arith.mulf %45, %44 : vector<1x512xf32>
    %47 = vector.extract_strided_slice %32 {offsets = [0, 3], sizes = [1, 1], strides = [1, 1]} : vector<1x128xf32> to vector<1x1xf32>
    %c11 = arith.constant 11 : index
    %c0_29 = arith.constant 0 : index
    %48 = vector.load %arg2[%c11, %c0_29] : memref<24x512xf32, #tpu.memory_space<vmem>>, vector<1x512xf32>
    %49 = vector.broadcast %47 : vector<1x1xf32> to vector<1x512xf32>
    %50 = arith.mulf %49, %48 : vector<1x512xf32>
    %51 = vector.extract_strided_slice %32 {offsets = [0, 4], sizes = [1, 1], strides = [1, 1]} : vector<1x128xf32> to vector<1x1xf32>
    %c12 = arith.constant 12 : index
    %c0_30 = arith.constant 0 : index
    %52 = vector.load %arg2[%c12, %c0_30] : memref<24x512xf32, #tpu.memory_space<vmem>>, vector<1x512xf32>
    %53 = vector.broadcast %51 : vector<1x1xf32> to vector<1x512xf32>
    %54 = arith.mulf %53, %52 : vector<1x512xf32>
    %55 = arith.addf %34, %38 : vector<1x512xf32>
    %56 = arith.addf %42, %46 : vector<1x512xf32>
    %57 = arith.addf %50, %54 : vector<1x512xf32>
    %58 = arith.addf %56, %57 : vector<1x512xf32>
    %59 = arith.addf %55, %58 : vector<1x512xf32>
    %60 = math.tanh %59 : vector<1x512xf32>
    %61 = vector.extract_strided_slice %60 {offsets = [0, 0], sizes = [1, 128], strides = [1, 1]} : vector<1x512xf32> to vector<1x128xf32>
    %cst_31 = arith.constant 5.000000e-01 : f32
    %62 = vector.broadcast %cst_31 : f32 to vector<1x128xf32>
    %63 = arith.mulf %62, %61 : vector<1x128xf32>
    %cst_32 = arith.constant 5.000000e-01 : f32
    %64 = vector.broadcast %cst_32 : f32 to vector<1x128xf32>
    %65 = arith.addf %63, %64 : vector<1x128xf32>
    %66 = vector.extract_strided_slice %60 {offsets = [0, 128], sizes = [1, 128], strides = [1, 1]} : vector<1x512xf32> to vector<1x128xf32>
    %cst_33 = arith.constant 5.000000e-01 : f32
    %67 = vector.broadcast %cst_33 : f32 to vector<1x128xf32>
    %68 = arith.mulf %67, %66 : vector<1x128xf32>
    %cst_34 = arith.constant 5.000000e-01 : f32
    %69 = vector.broadcast %cst_34 : f32 to vector<1x128xf32>
    %70 = arith.addf %68, %69 : vector<1x128xf32>
    %71 = vector.extract_strided_slice %60 {offsets = [0, 256], sizes = [1, 128], strides = [1, 1]} : vector<1x512xf32> to vector<1x128xf32>
    %72 = vector.extract_strided_slice %60 {offsets = [0, 384], sizes = [1, 128], strides = [1, 1]} : vector<1x512xf32> to vector<1x128xf32>
    %cst_35 = arith.constant 5.000000e-01 : f32
    %73 = vector.broadcast %cst_35 : f32 to vector<1x128xf32>
    %74 = arith.mulf %73, %72 : vector<1x128xf32>
    %cst_36 = arith.constant 5.000000e-01 : f32
    %75 = vector.broadcast %cst_36 : f32 to vector<1x128xf32>
    %76 = arith.addf %74, %75 : vector<1x128xf32>
    %77 = arith.mulf %70, %33 : vector<1x128xf32>
    %78 = arith.mulf %65, %71 : vector<1x128xf32>
    %79 = arith.addf %77, %78 : vector<1x128xf32>
    %80 = math.tanh %79 : vector<1x128xf32>
    %81 = arith.mulf %76, %80 : vector<1x128xf32>
    %c0_37 = arith.constant 0 : index
    %c0_38 = arith.constant 0 : index
    %82 = vector.load %arg5[%c0_37, %c0_38] : memref<8x128xf32, #tpu.memory_space<vmem>>, vector<1x128xf32>
    tpu.vector_store %arg5[%c0_37, %c0_38], %81 {strides = array<i32>} : memref<8x128xf32, #tpu.memory_space<vmem>>, vector<1x128xf32>,
    %c1 = arith.constant 1 : index
    %c0_39 = arith.constant 0 : index
    %83 = vector.load %arg4[%c1, %c0_39] : memref<8x512xf32, #tpu.memory_space<vmem>>, vector<1x512xf32>
    %84 = vector.extract_strided_slice %81 {offsets = [0, 0], sizes = [1, 1], strides = [1, 1]} : vector<1x128xf32> to vector<1x1xf32>
    %c8_40 = arith.constant 8 : index
    %c0_41 = arith.constant 0 : index
    %85 = vector.load %arg2[%c8_40, %c0_41] : memref<24x512xf32, #tpu.memory_space<vmem>>, vector<1x512xf32>
    %86 = vector.broadcast %84 : vector<1x1xf32> to vector<1x512xf32>
    %87 = arith.mulf %86, %85 : vector<1x512xf32>
    %88 = vector.extract_strided_slice %81 {offsets = [0, 1], sizes = [1, 1], strides = [1, 1]} : vector<1x128xf32> to vector<1x1xf32>
    %c9_42 = arith.constant 9 : index
    %c0_43 = arith.constant 0 : index
    %89 = vector.load %arg2[%c9_42, %c0_43] : memref<24x512xf32, #tpu.memory_space<vmem>>, vector<1x512xf32>
    %90 = vector.broadcast %88 : vector<1x1xf32> to vector<1x512xf32>
    %91 = arith.mulf %90, %89 : vector<1x512xf32>
    %92 = vector.extract_strided_slice %81 {offsets = [0, 2], sizes = [1, 1], strides = [1, 1]} : vector<1x128xf32> to vector<1x1xf32>
    %c10_44 = arith.constant 10 : index
    %c0_45 = arith.constant 0 : index
    %93 = vector.load %arg2[%c10_44, %c0_45] : memref<24x512xf32, #tpu.memory_space<vmem>>, vector<1x512xf32>
    %94 = vector.broadcast %92 : vector<1x1xf32> to vector<1x512xf32>
    %95 = arith.mulf %94, %93 : vector<1x512xf32>
    %96 = vector.extract_strided_slice %81 {offsets = [0, 3], sizes = [1, 1], strides = [1, 1]} : vector<1x128xf32> to vector<1x1xf32>
    %c11_46 = arith.constant 11 : index
    %c0_47 = arith.constant 0 : index
    %97 = vector.load %arg2[%c11_46, %c0_47] : memref<24x512xf32, #tpu.memory_space<vmem>>, vector<1x512xf32>
    %98 = vector.broadcast %96 : vector<1x1xf32> to vector<1x512xf32>
    %99 = arith.mulf %98, %97 : vector<1x512xf32>
    %100 = vector.extract_strided_slice %81 {offsets = [0, 4], sizes = [1, 1], strides = [1, 1]} : vector<1x128xf32> to vector<1x1xf32>
    %c12_48 = arith.constant 12 : index
    %c0_49 = arith.constant 0 : index
    %101 = vector.load %arg2[%c12_48, %c0_49] : memref<24x512xf32, #tpu.memory_space<vmem>>, vector<1x512xf32>
    %102 = vector.broadcast %100 : vector<1x1xf32> to vector<1x512xf32>
    %103 = arith.mulf %102, %101 : vector<1x512xf32>
    %104 = arith.addf %83, %87 : vector<1x512xf32>
    %105 = arith.addf %91, %95 : vector<1x512xf32>
    %106 = arith.addf %99, %103 : vector<1x512xf32>
    %107 = arith.addf %105, %106 : vector<1x512xf32>
    %108 = arith.addf %104, %107 : vector<1x512xf32>
    %109 = math.tanh %108 : vector<1x512xf32>
    %110 = vector.extract_strided_slice %109 {offsets = [0, 0], sizes = [1, 128], strides = [1, 1]} : vector<1x512xf32> to vector<1x128xf32>
    %cst_50 = arith.constant 5.000000e-01 : f32
    %111 = vector.broadcast %cst_50 : f32 to vector<1x128xf32>
    %112 = arith.mulf %111, %110 : vector<1x128xf32>
    %cst_51 = arith.constant 5.000000e-01 : f32
    %113 = vector.broadcast %cst_51 : f32 to vector<1x128xf32>
    %114 = arith.addf %112, %113 : vector<1x128xf32>
    %115 = vector.extract_strided_slice %109 {offsets = [0, 128], sizes = [1, 128], strides = [1, 1]} : vector<1x512xf32> to vector<1x128xf32>
    %cst_52 = arith.constant 5.000000e-01 : f32
    %116 = vector.broadcast %cst_52 : f32 to vector<1x128xf32>
    %117 = arith.mulf %116, %115 : vector<1x128xf32>
    %cst_53 = arith.constant 5.000000e-01 : f32
    %118 = vector.broadcast %cst_53 : f32 to vector<1x128xf32>
    %119 = arith.addf %117, %118 : vector<1x128xf32>
    %120 = vector.extract_strided_slice %109 {offsets = [0, 256], sizes = [1, 128], strides = [1, 1]} : vector<1x512xf32> to vector<1x128xf32>
    %121 = vector.extract_strided_slice %109 {offsets = [0, 384], sizes = [1, 128], strides = [1, 1]} : vector<1x512xf32> to vector<1x128xf32>
    %cst_54 = arith.constant 5.000000e-01 : f32
    %122 = vector.broadcast %cst_54 : f32 to vector<1x128xf32>
    %123 = arith.mulf %122, %121 : vector<1x128xf32>
    %cst_55 = arith.constant 5.000000e-01 : f32
    %124 = vector.broadcast %cst_55 : f32 to vector<1x128xf32>
    %125 = arith.addf %123, %124 : vector<1x128xf32>
    %126 = arith.mulf %119, %79 : vector<1x128xf32>
    %127 = arith.mulf %114, %120 : vector<1x128xf32>
    %128 = arith.addf %126, %127 : vector<1x128xf32>
    %129 = math.tanh %128 : vector<1x128xf32>
    %130 = arith.mulf %125, %129 : vector<1x128xf32>
    %c1_56 = arith.constant 1 : index
    %c0_57 = arith.constant 0 : index
    %131 = vector.load %arg5[%c1_56, %c0_57] : memref<8x128xf32, #tpu.memory_space<vmem>>, vector<1x128xf32>
    tpu.vector_store %arg5[%c1_56, %c0_57], %130 {strides = array<i32>} : memref<8x128xf32, #tpu.memory_space<vmem>>, vector<1x128xf32>,
    %c2 = arith.constant 2 : index
    %c0_58 = arith.constant 0 : index
    %132 = vector.load %arg4[%c2, %c0_58] : memref<8x512xf32, #tpu.memory_space<vmem>>, vector<1x512xf32>
    %133 = vector.extract_strided_slice %130 {offsets = [0, 0], sizes = [1, 1], strides = [1, 1]} : vector<1x128xf32> to vector<1x1xf32>
    %c8_59 = arith.constant 8 : index
    %c0_60 = arith.constant 0 : index
    %134 = vector.load %arg2[%c8_59, %c0_60] : memref<24x512xf32, #tpu.memory_space<vmem>>, vector<1x512xf32>
    %135 = vector.broadcast %133 : vector<1x1xf32> to vector<1x512xf32>
    %136 = arith.mulf %135, %134 : vector<1x512xf32>
    %137 = vector.extract_strided_slice %130 {offsets = [0, 1], sizes = [1, 1], strides = [1, 1]} : vector<1x128xf32> to vector<1x1xf32>
    %c9_61 = arith.constant 9 : index
    %c0_62 = arith.constant 0 : index
    %138 = vector.load %arg2[%c9_61, %c0_62] : memref<24x512xf32, #tpu.memory_space<vmem>>, vector<1x512xf32>
    %139 = vector.broadcast %137 : vector<1x1xf32> to vector<1x512xf32>
    %140 = arith.mulf %139, %138 : vector<1x512xf32>
    %141 = vector.extract_strided_slice %130 {offsets = [0, 2], sizes = [1, 1], strides = [1, 1]} : vector<1x128xf32> to vector<1x1xf32>
    %c10_63 = arith.constant 10 : index
    %c0_64 = arith.constant 0 : index
    %142 = vector.load %arg2[%c10_63, %c0_64] : memref<24x512xf32, #tpu.memory_space<vmem>>, vector<1x512xf32>
    %143 = vector.broadcast %141 : vector<1x1xf32> to vector<1x512xf32>
    %144 = arith.mulf %143, %142 : vector<1x512xf32>
    %145 = vector.extract_strided_slice %130 {offsets = [0, 3], sizes = [1, 1], strides = [1, 1]} : vector<1x128xf32> to vector<1x1xf32>
    %c11_65 = arith.constant 11 : index
    %c0_66 = arith.constant 0 : index
    %146 = vector.load %arg2[%c11_65, %c0_66] : memref<24x512xf32, #tpu.memory_space<vmem>>, vector<1x512xf32>
    %147 = vector.broadcast %145 : vector<1x1xf32> to vector<1x512xf32>
    %148 = arith.mulf %147, %146 : vector<1x512xf32>
    %149 = vector.extract_strided_slice %130 {offsets = [0, 4], sizes = [1, 1], strides = [1, 1]} : vector<1x128xf32> to vector<1x1xf32>
    %c12_67 = arith.constant 12 : index
    %c0_68 = arith.constant 0 : index
    %150 = vector.load %arg2[%c12_67, %c0_68] : memref<24x512xf32, #tpu.memory_space<vmem>>, vector<1x512xf32>
    %151 = vector.broadcast %149 : vector<1x1xf32> to vector<1x512xf32>
    %152 = arith.mulf %151, %150 : vector<1x512xf32>
    %153 = arith.addf %132, %136 : vector<1x512xf32>
    %154 = arith.addf %140, %144 : vector<1x512xf32>
    %155 = arith.addf %148, %152 : vector<1x512xf32>
    %156 = arith.addf %154, %155 : vector<1x512xf32>
    %157 = arith.addf %153, %156 : vector<1x512xf32>
    %158 = math.tanh %157 : vector<1x512xf32>
    %159 = vector.extract_strided_slice %158 {offsets = [0, 0], sizes = [1, 128], strides = [1, 1]} : vector<1x512xf32> to vector<1x128xf32>
    %cst_69 = arith.constant 5.000000e-01 : f32
    %160 = vector.broadcast %cst_69 : f32 to vector<1x128xf32>
    %161 = arith.mulf %160, %159 : vector<1x128xf32>
    %cst_70 = arith.constant 5.000000e-01 : f32
    %162 = vector.broadcast %cst_70 : f32 to vector<1x128xf32>
    %163 = arith.addf %161, %162 : vector<1x128xf32>
    %164 = vector.extract_strided_slice %158 {offsets = [0, 128], sizes = [1, 128], strides = [1, 1]} : vector<1x512xf32> to vector<1x128xf32>
    %cst_71 = arith.constant 5.000000e-01 : f32
    %165 = vector.broadcast %cst_71 : f32 to vector<1x128xf32>
    %166 = arith.mulf %165, %164 : vector<1x128xf32>
    %cst_72 = arith.constant 5.000000e-01 : f32
    %167 = vector.broadcast %cst_72 : f32 to vector<1x128xf32>
    %168 = arith.addf %166, %167 : vector<1x128xf32>
    %169 = vector.extract_strided_slice %158 {offsets = [0, 256], sizes = [1, 128], strides = [1, 1]} : vector<1x512xf32> to vector<1x128xf32>
    %170 = vector.extract_strided_slice %158 {offsets = [0, 384], sizes = [1, 128], strides = [1, 1]} : vector<1x512xf32> to vector<1x128xf32>
    %cst_73 = arith.constant 5.000000e-01 : f32
    %171 = vector.broadcast %cst_73 : f32 to vector<1x128xf32>
    %172 = arith.mulf %171, %170 : vector<1x128xf32>
    %cst_74 = arith.constant 5.000000e-01 : f32
    %173 = vector.broadcast %cst_74 : f32 to vector<1x128xf32>
    %174 = arith.addf %172, %173 : vector<1x128xf32>
    %175 = arith.mulf %168, %128 : vector<1x128xf32>
    %176 = arith.mulf %163, %169 : vector<1x128xf32>
    %177 = arith.addf %175, %176 : vector<1x128xf32>
    %178 = math.tanh %177 : vector<1x128xf32>
    %179 = arith.mulf %174, %178 : vector<1x128xf32>
    %c2_75 = arith.constant 2 : index
    %c0_76 = arith.constant 0 : index
    %180 = vector.load %arg5[%c2_75, %c0_76] : memref<8x128xf32, #tpu.memory_space<vmem>>, vector<1x128xf32>
    tpu.vector_store %arg5[%c2_75, %c0_76], %179 {strides = array<i32>} : memref<8x128xf32, #tpu.memory_space<vmem>>, vector<1x128xf32>,
    %c3 = arith.constant 3 : index
    %c0_77 = arith.constant 0 : index
    %181 = vector.load %arg4[%c3, %c0_77] : memref<8x512xf32, #tpu.memory_space<vmem>>, vector<1x512xf32>
    %182 = vector.extract_strided_slice %179 {offsets = [0, 0], sizes = [1, 1], strides = [1, 1]} : vector<1x128xf32> to vector<1x1xf32>
    %c8_78 = arith.constant 8 : index
    %c0_79 = arith.constant 0 : index
    %183 = vector.load %arg2[%c8_78, %c0_79] : memref<24x512xf32, #tpu.memory_space<vmem>>, vector<1x512xf32>
    %184 = vector.broadcast %182 : vector<1x1xf32> to vector<1x512xf32>
    %185 = arith.mulf %184, %183 : vector<1x512xf32>
    %186 = vector.extract_strided_slice %179 {offsets = [0, 1], sizes = [1, 1], strides = [1, 1]} : vector<1x128xf32> to vector<1x1xf32>
    %c9_80 = arith.constant 9 : index
    %c0_81 = arith.constant 0 : index
    %187 = vector.load %arg2[%c9_80, %c0_81] : memref<24x512xf32, #tpu.memory_space<vmem>>, vector<1x512xf32>
    %188 = vector.broadcast %186 : vector<1x1xf32> to vector<1x512xf32>
    %189 = arith.mulf %188, %187 : vector<1x512xf32>
    %190 = vector.extract_strided_slice %179 {offsets = [0, 2], sizes = [1, 1], strides = [1, 1]} : vector<1x128xf32> to vector<1x1xf32>
    %c10_82 = arith.constant 10 : index
    %c0_83 = arith.constant 0 : index
    %191 = vector.load %arg2[%c10_82, %c0_83] : memref<24x512xf32, #tpu.memory_space<vmem>>, vector<1x512xf32>
    %192 = vector.broadcast %190 : vector<1x1xf32> to vector<1x512xf32>
    %193 = arith.mulf %192, %191 : vector<1x512xf32>
    %194 = vector.extract_strided_slice %179 {offsets = [0, 3], sizes = [1, 1], strides = [1, 1]} : vector<1x128xf32> to vector<1x1xf32>
    %c11_84 = arith.constant 11 : index
    %c0_85 = arith.constant 0 : index
    %195 = vector.load %arg2[%c11_84, %c0_85] : memref<24x512xf32, #tpu.memory_space<vmem>>, vector<1x512xf32>
    %196 = vector.broadcast %194 : vector<1x1xf32> to vector<1x512xf32>
    %197 = arith.mulf %196, %195 : vector<1x512xf32>
    %198 = vector.extract_strided_slice %179 {offsets = [0, 4], sizes = [1, 1], strides = [1, 1]} : vector<1x128xf32> to vector<1x1xf32>
    %c12_86 = arith.constant 12 : index
    %c0_87 = arith.constant 0 : index
    %199 = vector.load %arg2[%c12_86, %c0_87] : memref<24x512xf32, #tpu.memory_space<vmem>>, vector<1x512xf32>
    %200 = vector.broadcast %198 : vector<1x1xf32> to vector<1x512xf32>
    %201 = arith.mulf %200, %199 : vector<1x512xf32>
    %202 = arith.addf %181, %185 : vector<1x512xf32>
    %203 = arith.addf %189, %193 : vector<1x512xf32>
    %204 = arith.addf %197, %201 : vector<1x512xf32>
    %205 = arith.addf %203, %204 : vector<1x512xf32>
    %206 = arith.addf %202, %205 : vector<1x512xf32>
    %207 = math.tanh %206 : vector<1x512xf32>
    %208 = vector.extract_strided_slice %207 {offsets = [0, 0], sizes = [1, 128], strides = [1, 1]} : vector<1x512xf32> to vector<1x128xf32>
    %cst_88 = arith.constant 5.000000e-01 : f32
    %209 = vector.broadcast %cst_88 : f32 to vector<1x128xf32>
    %210 = arith.mulf %209, %208 : vector<1x128xf32>
    %cst_89 = arith.constant 5.000000e-01 : f32
    %211 = vector.broadcast %cst_89 : f32 to vector<1x128xf32>
    %212 = arith.addf %210, %211 : vector<1x128xf32>
    %213 = vector.extract_strided_slice %207 {offsets = [0, 128], sizes = [1, 128], strides = [1, 1]} : vector<1x512xf32> to vector<1x128xf32>
    %cst_90 = arith.constant 5.000000e-01 : f32
    %214 = vector.broadcast %cst_90 : f32 to vector<1x128xf32>
    %215 = arith.mulf %214, %213 : vector<1x128xf32>
    %cst_91 = arith.constant 5.000000e-01 : f32
    %216 = vector.broadcast %cst_91 : f32 to vector<1x128xf32>
    %217 = arith.addf %215, %216 : vector<1x128xf32>
    %218 = vector.extract_strided_slice %207 {offsets = [0, 256], sizes = [1, 128], strides = [1, 1]} : vector<1x512xf32> to vector<1x128xf32>
    %219 = vector.extract_strided_slice %207 {offsets = [0, 384], sizes = [1, 128], strides = [1, 1]} : vector<1x512xf32> to vector<1x128xf32>
    %cst_92 = arith.constant 5.000000e-01 : f32
    %220 = vector.broadcast %cst_92 : f32 to vector<1x128xf32>
    %221 = arith.mulf %220, %219 : vector<1x128xf32>
    %cst_93 = arith.constant 5.000000e-01 : f32
    %222 = vector.broadcast %cst_93 : f32 to vector<1x128xf32>
    %223 = arith.addf %221, %222 : vector<1x128xf32>
    %224 = arith.mulf %217, %177 : vector<1x128xf32>
    %225 = arith.mulf %212, %218 : vector<1x128xf32>
    %226 = arith.addf %224, %225 : vector<1x128xf32>
    %227 = math.tanh %226 : vector<1x128xf32>
    %228 = arith.mulf %223, %227 : vector<1x128xf32>
    %c3_94 = arith.constant 3 : index
    %c0_95 = arith.constant 0 : index
    %229 = vector.load %arg5[%c3_94, %c0_95] : memref<8x128xf32, #tpu.memory_space<vmem>>, vector<1x128xf32>
    tpu.vector_store %arg5[%c3_94, %c0_95], %228 {strides = array<i32>} : memref<8x128xf32, #tpu.memory_space<vmem>>, vector<1x128xf32>,
    %c4 = arith.constant 4 : index
    %c0_96 = arith.constant 0 : index
    %230 = vector.load %arg4[%c4, %c0_96] : memref<8x512xf32, #tpu.memory_space<vmem>>, vector<1x512xf32>
    %231 = vector.extract_strided_slice %228 {offsets = [0, 0], sizes = [1, 1], strides = [1, 1]} : vector<1x128xf32> to vector<1x1xf32>
    %c8_97 = arith.constant 8 : index
    %c0_98 = arith.constant 0 : index
    %232 = vector.load %arg2[%c8_97, %c0_98] : memref<24x512xf32, #tpu.memory_space<vmem>>, vector<1x512xf32>
    %233 = vector.broadcast %231 : vector<1x1xf32> to vector<1x512xf32>
    %234 = arith.mulf %233, %232 : vector<1x512xf32>
    %235 = vector.extract_strided_slice %228 {offsets = [0, 1], sizes = [1, 1], strides = [1, 1]} : vector<1x128xf32> to vector<1x1xf32>
    %c9_99 = arith.constant 9 : index
    %c0_100 = arith.constant 0 : index
    %236 = vector.load %arg2[%c9_99, %c0_100] : memref<24x512xf32, #tpu.memory_space<vmem>>, vector<1x512xf32>
    %237 = vector.broadcast %235 : vector<1x1xf32> to vector<1x512xf32>
    %238 = arith.mulf %237, %236 : vector<1x512xf32>
    %239 = vector.extract_strided_slice %228 {offsets = [0, 2], sizes = [1, 1], strides = [1, 1]} : vector<1x128xf32> to vector<1x1xf32>
    %c10_101 = arith.constant 10 : index
    %c0_102 = arith.constant 0 : index
    %240 = vector.load %arg2[%c10_101, %c0_102] : memref<24x512xf32, #tpu.memory_space<vmem>>, vector<1x512xf32>
    %241 = vector.broadcast %239 : vector<1x1xf32> to vector<1x512xf32>
    %242 = arith.mulf %241, %240 : vector<1x512xf32>
    %243 = vector.extract_strided_slice %228 {offsets = [0, 3], sizes = [1, 1], strides = [1, 1]} : vector<1x128xf32> to vector<1x1xf32>
    %c11_103 = arith.constant 11 : index
    %c0_104 = arith.constant 0 : index
    %244 = vector.load %arg2[%c11_103, %c0_104] : memref<24x512xf32, #tpu.memory_space<vmem>>, vector<1x512xf32>
    %245 = vector.broadcast %243 : vector<1x1xf32> to vector<1x512xf32>
    %246 = arith.mulf %245, %244 : vector<1x512xf32>
    %247 = vector.extract_strided_slice %228 {offsets = [0, 4], sizes = [1, 1], strides = [1, 1]} : vector<1x128xf32> to vector<1x1xf32>
    %c12_105 = arith.constant 12 : index
    %c0_106 = arith.constant 0 : index
    %248 = vector.load %arg2[%c12_105, %c0_106] : memref<24x512xf32, #tpu.memory_space<vmem>>, vector<1x512xf32>
    %249 = vector.broadcast %247 : vector<1x1xf32> to vector<1x512xf32>
    %250 = arith.mulf %249, %248 : vector<1x512xf32>
    %251 = arith.addf %230, %234 : vector<1x512xf32>
    %252 = arith.addf %238, %242 : vector<1x512xf32>
    %253 = arith.addf %246, %250 : vector<1x512xf32>
    %254 = arith.addf %252, %253 : vector<1x512xf32>
    %255 = arith.addf %251, %254 : vector<1x512xf32>
    %256 = math.tanh %255 : vector<1x512xf32>
    %257 = vector.extract_strided_slice %256 {offsets = [0, 0], sizes = [1, 128], strides = [1, 1]} : vector<1x512xf32> to vector<1x128xf32>
    %cst_107 = arith.constant 5.000000e-01 : f32
    %258 = vector.broadcast %cst_107 : f32 to vector<1x128xf32>
    %259 = arith.mulf %258, %257 : vector<1x128xf32>
    %cst_108 = arith.constant 5.000000e-01 : f32
    %260 = vector.broadcast %cst_108 : f32 to vector<1x128xf32>
    %261 = arith.addf %259, %260 : vector<1x128xf32>
    %262 = vector.extract_strided_slice %256 {offsets = [0, 128], sizes = [1, 128], strides = [1, 1]} : vector<1x512xf32> to vector<1x128xf32>
    %cst_109 = arith.constant 5.000000e-01 : f32
    %263 = vector.broadcast %cst_109 : f32 to vector<1x128xf32>
    %264 = arith.mulf %263, %262 : vector<1x128xf32>
    %cst_110 = arith.constant 5.000000e-01 : f32
    %265 = vector.broadcast %cst_110 : f32 to vector<1x128xf32>
    %266 = arith.addf %264, %265 : vector<1x128xf32>
    %267 = vector.extract_strided_slice %256 {offsets = [0, 256], sizes = [1, 128], strides = [1, 1]} : vector<1x512xf32> to vector<1x128xf32>
    %268 = vector.extract_strided_slice %256 {offsets = [0, 384], sizes = [1, 128], strides = [1, 1]} : vector<1x512xf32> to vector<1x128xf32>
    %cst_111 = arith.constant 5.000000e-01 : f32
    %269 = vector.broadcast %cst_111 : f32 to vector<1x128xf32>
    %270 = arith.mulf %269, %268 : vector<1x128xf32>
    %cst_112 = arith.constant 5.000000e-01 : f32
    %271 = vector.broadcast %cst_112 : f32 to vector<1x128xf32>
    %272 = arith.addf %270, %271 : vector<1x128xf32>
    %273 = arith.mulf %266, %226 : vector<1x128xf32>
    %274 = arith.mulf %261, %267 : vector<1x128xf32>
    %275 = arith.addf %273, %274 : vector<1x128xf32>
    %276 = math.tanh %275 : vector<1x128xf32>
    %277 = arith.mulf %272, %276 : vector<1x128xf32>
    %c4_113 = arith.constant 4 : index
    %c0_114 = arith.constant 0 : index
    %278 = vector.load %arg5[%c4_113, %c0_114] : memref<8x128xf32, #tpu.memory_space<vmem>>, vector<1x128xf32>
    tpu.vector_store %arg5[%c4_113, %c0_114], %277 {strides = array<i32>} : memref<8x128xf32, #tpu.memory_space<vmem>>, vector<1x128xf32>,
    %c5 = arith.constant 5 : index
    %c0_115 = arith.constant 0 : index
    %279 = vector.load %arg4[%c5, %c0_115] : memref<8x512xf32, #tpu.memory_space<vmem>>, vector<1x512xf32>
    %280 = vector.extract_strided_slice %277 {offsets = [0, 0], sizes = [1, 1], strides = [1, 1]} : vector<1x128xf32> to vector<1x1xf32>
    %c8_116 = arith.constant 8 : index
    %c0_117 = arith.constant 0 : index
    %281 = vector.load %arg2[%c8_116, %c0_117] : memref<24x512xf32, #tpu.memory_space<vmem>>, vector<1x512xf32>
    %282 = vector.broadcast %280 : vector<1x1xf32> to vector<1x512xf32>
    %283 = arith.mulf %282, %281 : vector<1x512xf32>
    %284 = vector.extract_strided_slice %277 {offsets = [0, 1], sizes = [1, 1], strides = [1, 1]} : vector<1x128xf32> to vector<1x1xf32>
    %c9_118 = arith.constant 9 : index
    %c0_119 = arith.constant 0 : index
    %285 = vector.load %arg2[%c9_118, %c0_119] : memref<24x512xf32, #tpu.memory_space<vmem>>, vector<1x512xf32>
    %286 = vector.broadcast %284 : vector<1x1xf32> to vector<1x512xf32>
    %287 = arith.mulf %286, %285 : vector<1x512xf32>
    %288 = vector.extract_strided_slice %277 {offsets = [0, 2], sizes = [1, 1], strides = [1, 1]} : vector<1x128xf32> to vector<1x1xf32>
    %c10_120 = arith.constant 10 : index
    %c0_121 = arith.constant 0 : index
    %289 = vector.load %arg2[%c10_120, %c0_121] : memref<24x512xf32, #tpu.memory_space<vmem>>, vector<1x512xf32>
    %290 = vector.broadcast %288 : vector<1x1xf32> to vector<1x512xf32>
    %291 = arith.mulf %290, %289 : vector<1x512xf32>
    %292 = vector.extract_strided_slice %277 {offsets = [0, 3], sizes = [1, 1], strides = [1, 1]} : vector<1x128xf32> to vector<1x1xf32>
    %c11_122 = arith.constant 11 : index
    %c0_123 = arith.constant 0 : index
    %293 = vector.load %arg2[%c11_122, %c0_123] : memref<24x512xf32, #tpu.memory_space<vmem>>, vector<1x512xf32>
    %294 = vector.broadcast %292 : vector<1x1xf32> to vector<1x512xf32>
    %295 = arith.mulf %294, %293 : vector<1x512xf32>
    %296 = vector.extract_strided_slice %277 {offsets = [0, 4], sizes = [1, 1], strides = [1, 1]} : vector<1x128xf32> to vector<1x1xf32>
    %c12_124 = arith.constant 12 : index
    %c0_125 = arith.constant 0 : index
    %297 = vector.load %arg2[%c12_124, %c0_125] : memref<24x512xf32, #tpu.memory_space<vmem>>, vector<1x512xf32>
    %298 = vector.broadcast %296 : vector<1x1xf32> to vector<1x512xf32>
    %299 = arith.mulf %298, %297 : vector<1x512xf32>
    %300 = arith.addf %279, %283 : vector<1x512xf32>
    %301 = arith.addf %287, %291 : vector<1x512xf32>
    %302 = arith.addf %295, %299 : vector<1x512xf32>
    %303 = arith.addf %301, %302 : vector<1x512xf32>
    %304 = arith.addf %300, %303 : vector<1x512xf32>
    %305 = math.tanh %304 : vector<1x512xf32>
    %306 = vector.extract_strided_slice %305 {offsets = [0, 0], sizes = [1, 128], strides = [1, 1]} : vector<1x512xf32> to vector<1x128xf32>
    %cst_126 = arith.constant 5.000000e-01 : f32
    %307 = vector.broadcast %cst_126 : f32 to vector<1x128xf32>
    %308 = arith.mulf %307, %306 : vector<1x128xf32>
    %cst_127 = arith.constant 5.000000e-01 : f32
    %309 = vector.broadcast %cst_127 : f32 to vector<1x128xf32>
    %310 = arith.addf %308, %309 : vector<1x128xf32>
    %311 = vector.extract_strided_slice %305 {offsets = [0, 128], sizes = [1, 128], strides = [1, 1]} : vector<1x512xf32> to vector<1x128xf32>
    %cst_128 = arith.constant 5.000000e-01 : f32
    %312 = vector.broadcast %cst_128 : f32 to vector<1x128xf32>
    %313 = arith.mulf %312, %311 : vector<1x128xf32>
    %cst_129 = arith.constant 5.000000e-01 : f32
    %314 = vector.broadcast %cst_129 : f32 to vector<1x128xf32>
    %315 = arith.addf %313, %314 : vector<1x128xf32>
    %316 = vector.extract_strided_slice %305 {offsets = [0, 256], sizes = [1, 128], strides = [1, 1]} : vector<1x512xf32> to vector<1x128xf32>
    %317 = vector.extract_strided_slice %305 {offsets = [0, 384], sizes = [1, 128], strides = [1, 1]} : vector<1x512xf32> to vector<1x128xf32>
    %cst_130 = arith.constant 5.000000e-01 : f32
    %318 = vector.broadcast %cst_130 : f32 to vector<1x128xf32>
    %319 = arith.mulf %318, %317 : vector<1x128xf32>
    %cst_131 = arith.constant 5.000000e-01 : f32
    %320 = vector.broadcast %cst_131 : f32 to vector<1x128xf32>
    %321 = arith.addf %319, %320 : vector<1x128xf32>
    %322 = arith.mulf %315, %275 : vector<1x128xf32>
    %323 = arith.mulf %310, %316 : vector<1x128xf32>
    %324 = arith.addf %322, %323 : vector<1x128xf32>
    %325 = math.tanh %324 : vector<1x128xf32>
    %326 = arith.mulf %321, %325 : vector<1x128xf32>
    %c5_132 = arith.constant 5 : index
    %c0_133 = arith.constant 0 : index
    %327 = vector.load %arg5[%c5_132, %c0_133] : memref<8x128xf32, #tpu.memory_space<vmem>>, vector<1x128xf32>
    tpu.vector_store %arg5[%c5_132, %c0_133], %326 {strides = array<i32>} : memref<8x128xf32, #tpu.memory_space<vmem>>, vector<1x128xf32>,
    %c6 = arith.constant 6 : index
    %c0_134 = arith.constant 0 : index
    %328 = vector.load %arg4[%c6, %c0_134] : memref<8x512xf32, #tpu.memory_space<vmem>>, vector<1x512xf32>
    %329 = vector.extract_strided_slice %326 {offsets = [0, 0], sizes = [1, 1], strides = [1, 1]} : vector<1x128xf32> to vector<1x1xf32>
    %c8_135 = arith.constant 8 : index
    %c0_136 = arith.constant 0 : index
    %330 = vector.load %arg2[%c8_135, %c0_136] : memref<24x512xf32, #tpu.memory_space<vmem>>, vector<1x512xf32>
    %331 = vector.broadcast %329 : vector<1x1xf32> to vector<1x512xf32>
    %332 = arith.mulf %331, %330 : vector<1x512xf32>
    %333 = vector.extract_strided_slice %326 {offsets = [0, 1], sizes = [1, 1], strides = [1, 1]} : vector<1x128xf32> to vector<1x1xf32>
    %c9_137 = arith.constant 9 : index
    %c0_138 = arith.constant 0 : index
    %334 = vector.load %arg2[%c9_137, %c0_138] : memref<24x512xf32, #tpu.memory_space<vmem>>, vector<1x512xf32>
    %335 = vector.broadcast %333 : vector<1x1xf32> to vector<1x512xf32>
    %336 = arith.mulf %335, %334 : vector<1x512xf32>
    %337 = vector.extract_strided_slice %326 {offsets = [0, 2], sizes = [1, 1], strides = [1, 1]} : vector<1x128xf32> to vector<1x1xf32>
    %c10_139 = arith.constant 10 : index
    %c0_140 = arith.constant 0 : index
    %338 = vector.load %arg2[%c10_139, %c0_140] : memref<24x512xf32, #tpu.memory_space<vmem>>, vector<1x512xf32>
    %339 = vector.broadcast %337 : vector<1x1xf32> to vector<1x512xf32>
    %340 = arith.mulf %339, %338 : vector<1x512xf32>
    %341 = vector.extract_strided_slice %326 {offsets = [0, 3], sizes = [1, 1], strides = [1, 1]} : vector<1x128xf32> to vector<1x1xf32>
    %c11_141 = arith.constant 11 : index
    %c0_142 = arith.constant 0 : index
    %342 = vector.load %arg2[%c11_141, %c0_142] : memref<24x512xf32, #tpu.memory_space<vmem>>, vector<1x512xf32>
    %343 = vector.broadcast %341 : vector<1x1xf32> to vector<1x512xf32>
    %344 = arith.mulf %343, %342 : vector<1x512xf32>
    %345 = vector.extract_strided_slice %326 {offsets = [0, 4], sizes = [1, 1], strides = [1, 1]} : vector<1x128xf32> to vector<1x1xf32>
    %c12_143 = arith.constant 12 : index
    %c0_144 = arith.constant 0 : index
    %346 = vector.load %arg2[%c12_143, %c0_144] : memref<24x512xf32, #tpu.memory_space<vmem>>, vector<1x512xf32>
    %347 = vector.broadcast %345 : vector<1x1xf32> to vector<1x512xf32>
    %348 = arith.mulf %347, %346 : vector<1x512xf32>
    %349 = arith.addf %328, %332 : vector<1x512xf32>
    %350 = arith.addf %336, %340 : vector<1x512xf32>
    %351 = arith.addf %344, %348 : vector<1x512xf32>
    %352 = arith.addf %350, %351 : vector<1x512xf32>
    %353 = arith.addf %349, %352 : vector<1x512xf32>
    %354 = math.tanh %353 : vector<1x512xf32>
    %355 = vector.extract_strided_slice %354 {offsets = [0, 0], sizes = [1, 128], strides = [1, 1]} : vector<1x512xf32> to vector<1x128xf32>
    %cst_145 = arith.constant 5.000000e-01 : f32
    %356 = vector.broadcast %cst_145 : f32 to vector<1x128xf32>
    %357 = arith.mulf %356, %355 : vector<1x128xf32>
    %cst_146 = arith.constant 5.000000e-01 : f32
    %358 = vector.broadcast %cst_146 : f32 to vector<1x128xf32>
    %359 = arith.addf %357, %358 : vector<1x128xf32>
    %360 = vector.extract_strided_slice %354 {offsets = [0, 128], sizes = [1, 128], strides = [1, 1]} : vector<1x512xf32> to vector<1x128xf32>
    %cst_147 = arith.constant 5.000000e-01 : f32
    %361 = vector.broadcast %cst_147 : f32 to vector<1x128xf32>
    %362 = arith.mulf %361, %360 : vector<1x128xf32>
    %cst_148 = arith.constant 5.000000e-01 : f32
    %363 = vector.broadcast %cst_148 : f32 to vector<1x128xf32>
    %364 = arith.addf %362, %363 : vector<1x128xf32>
    %365 = vector.extract_strided_slice %354 {offsets = [0, 256], sizes = [1, 128], strides = [1, 1]} : vector<1x512xf32> to vector<1x128xf32>
    %366 = vector.extract_strided_slice %354 {offsets = [0, 384], sizes = [1, 128], strides = [1, 1]} : vector<1x512xf32> to vector<1x128xf32>
    %cst_149 = arith.constant 5.000000e-01 : f32
    %367 = vector.broadcast %cst_149 : f32 to vector<1x128xf32>
    %368 = arith.mulf %367, %366 : vector<1x128xf32>
    %cst_150 = arith.constant 5.000000e-01 : f32
    %369 = vector.broadcast %cst_150 : f32 to vector<1x128xf32>
    %370 = arith.addf %368, %369 : vector<1x128xf32>
    %371 = arith.mulf %364, %324 : vector<1x128xf32>
    %372 = arith.mulf %359, %365 : vector<1x128xf32>
    %373 = arith.addf %371, %372 : vector<1x128xf32>
    %374 = math.tanh %373 : vector<1x128xf32>
    %375 = arith.mulf %370, %374 : vector<1x128xf32>
    %c6_151 = arith.constant 6 : index
    %c0_152 = arith.constant 0 : index
    %376 = vector.load %arg5[%c6_151, %c0_152] : memref<8x128xf32, #tpu.memory_space<vmem>>, vector<1x128xf32>
    tpu.vector_store %arg5[%c6_151, %c0_152], %375 {strides = array<i32>} : memref<8x128xf32, #tpu.memory_space<vmem>>, vector<1x128xf32>,
    %c7 = arith.constant 7 : index
    %c0_153 = arith.constant 0 : index
    %377 = vector.load %arg4[%c7, %c0_153] : memref<8x512xf32, #tpu.memory_space<vmem>>, vector<1x512xf32>
    %378 = vector.extract_strided_slice %375 {offsets = [0, 0], sizes = [1, 1], strides = [1, 1]} : vector<1x128xf32> to vector<1x1xf32>
    %c8_154 = arith.constant 8 : index
    %c0_155 = arith.constant 0 : index
    %379 = vector.load %arg2[%c8_154, %c0_155] : memref<24x512xf32, #tpu.memory_space<vmem>>, vector<1x512xf32>
    %380 = vector.broadcast %378 : vector<1x1xf32> to vector<1x512xf32>
    %381 = arith.mulf %380, %379 : vector<1x512xf32>
    %382 = vector.extract_strided_slice %375 {offsets = [0, 1], sizes = [1, 1], strides = [1, 1]} : vector<1x128xf32> to vector<1x1xf32>
    %c9_156 = arith.constant 9 : index
    %c0_157 = arith.constant 0 : index
    %383 = vector.load %arg2[%c9_156, %c0_157] : memref<24x512xf32, #tpu.memory_space<vmem>>, vector<1x512xf32>
    %384 = vector.broadcast %382 : vector<1x1xf32> to vector<1x512xf32>
    %385 = arith.mulf %384, %383 : vector<1x512xf32>
    %386 = vector.extract_strided_slice %375 {offsets = [0, 2], sizes = [1, 1], strides = [1, 1]} : vector<1x128xf32> to vector<1x1xf32>
    %c10_158 = arith.constant 10 : index
    %c0_159 = arith.constant 0 : index
    %387 = vector.load %arg2[%c10_158, %c0_159] : memref<24x512xf32, #tpu.memory_space<vmem>>, vector<1x512xf32>
    %388 = vector.broadcast %386 : vector<1x1xf32> to vector<1x512xf32>
    %389 = arith.mulf %388, %387 : vector<1x512xf32>
    %390 = vector.extract_strided_slice %375 {offsets = [0, 3], sizes = [1, 1], strides = [1, 1]} : vector<1x128xf32> to vector<1x1xf32>
    %c11_160 = arith.constant 11 : index
    %c0_161 = arith.constant 0 : index
    %391 = vector.load %arg2[%c11_160, %c0_161] : memref<24x512xf32, #tpu.memory_space<vmem>>, vector<1x512xf32>
    %392 = vector.broadcast %390 : vector<1x1xf32> to vector<1x512xf32>
    %393 = arith.mulf %392, %391 : vector<1x512xf32>
    %394 = vector.extract_strided_slice %375 {offsets = [0, 4], sizes = [1, 1], strides = [1, 1]} : vector<1x128xf32> to vector<1x1xf32>
    %c12_162 = arith.constant 12 : index
    %c0_163 = arith.constant 0 : index
    %395 = vector.load %arg2[%c12_162, %c0_163] : memref<24x512xf32, #tpu.memory_space<vmem>>, vector<1x512xf32>
    %396 = vector.broadcast %394 : vector<1x1xf32> to vector<1x512xf32>
    %397 = arith.mulf %396, %395 : vector<1x512xf32>
    %398 = arith.addf %377, %381 : vector<1x512xf32>
    %399 = arith.addf %385, %389 : vector<1x512xf32>
    %400 = arith.addf %393, %397 : vector<1x512xf32>
    %401 = arith.addf %399, %400 : vector<1x512xf32>
    %402 = arith.addf %398, %401 : vector<1x512xf32>
    %403 = math.tanh %402 : vector<1x512xf32>
    %404 = vector.extract_strided_slice %403 {offsets = [0, 0], sizes = [1, 128], strides = [1, 1]} : vector<1x512xf32> to vector<1x128xf32>
    %cst_164 = arith.constant 5.000000e-01 : f32
    %405 = vector.broadcast %cst_164 : f32 to vector<1x128xf32>
    %406 = arith.mulf %405, %404 : vector<1x128xf32>
    %cst_165 = arith.constant 5.000000e-01 : f32
    %407 = vector.broadcast %cst_165 : f32 to vector<1x128xf32>
    %408 = arith.addf %406, %407 : vector<1x128xf32>
    %409 = vector.extract_strided_slice %403 {offsets = [0, 128], sizes = [1, 128], strides = [1, 1]} : vector<1x512xf32> to vector<1x128xf32>
    %cst_166 = arith.constant 5.000000e-01 : f32
    %410 = vector.broadcast %cst_166 : f32 to vector<1x128xf32>
    %411 = arith.mulf %410, %409 : vector<1x128xf32>
    %cst_167 = arith.constant 5.000000e-01 : f32
    %412 = vector.broadcast %cst_167 : f32 to vector<1x128xf32>
    %413 = arith.addf %411, %412 : vector<1x128xf32>
    %414 = vector.extract_strided_slice %403 {offsets = [0, 256], sizes = [1, 128], strides = [1, 1]} : vector<1x512xf32> to vector<1x128xf32>
    %415 = vector.extract_strided_slice %403 {offsets = [0, 384], sizes = [1, 128], strides = [1, 1]} : vector<1x512xf32> to vector<1x128xf32>
    %cst_168 = arith.constant 5.000000e-01 : f32
    %416 = vector.broadcast %cst_168 : f32 to vector<1x128xf32>
    %417 = arith.mulf %416, %415 : vector<1x128xf32>
    %cst_169 = arith.constant 5.000000e-01 : f32
    %418 = vector.broadcast %cst_169 : f32 to vector<1x128xf32>
    %419 = arith.addf %417, %418 : vector<1x128xf32>
    %420 = arith.mulf %413, %373 : vector<1x128xf32>
    %421 = arith.mulf %408, %414 : vector<1x128xf32>
    %422 = arith.addf %420, %421 : vector<1x128xf32>
    %423 = math.tanh %422 : vector<1x128xf32>
    %424 = arith.mulf %419, %423 : vector<1x128xf32>
    %c7_170 = arith.constant 7 : index
    %c0_171 = arith.constant 0 : index
    %425 = vector.load %arg5[%c7_170, %c0_171] : memref<8x128xf32, #tpu.memory_space<vmem>>, vector<1x128xf32>
    tpu.vector_store %arg5[%c7_170, %c0_171], %424 {strides = array<i32>} : memref<8x128xf32, #tpu.memory_space<vmem>>, vector<1x128xf32>,
    %c0_172 = arith.constant 0 : index
    %c0_173 = arith.constant 0 : index
    %426 = vector.load %arg5[%c0_172, %c0_173] : memref<8x128xf32, #tpu.memory_space<vmem>>, vector<8x128xf32>
    %427 = vector.extract_strided_slice %426 {offsets = [0, 0], sizes = [8, 8], strides = [1, 1]} : vector<8x128xf32> to vector<8x8xf32>
    %c136 = arith.constant 136 : index
    %c0_174 = arith.constant 0 : index
    %428 = vector.load %arg1[%c136, %c0_174] : memref<152x128xf32, #tpu.memory_space<vmem>>, vector<8x128xf32>
    %cst_175 = arith.constant dense<0.000000e+00> : vector<8x128xf32>
    %429 = tpu.matmul %427, %428, %cst_175 {dimension_numbers = #tpu.dot_dimension_numbers<[1], [0], [0], [1], [0, 0, 1, 1], [], []>} : vector<8x8xf32>, vector<8x128xf32>, vector<8x128xf32> -> vector<8x128xf32>
    %c147 = arith.constant 147 : index
    %c0_176 = arith.constant 0 : index
    %430 = vector.load %arg1[%c147, %c0_176] : memref<152x128xf32, #tpu.memory_space<vmem>>, vector<1x128xf32>
    %431 = vector.broadcast %430 : vector<1x128xf32> to vector<8x128xf32>
    %432 = arith.addf %429, %431 : vector<8x128xf32>
    %cst_177 = arith.constant dense<0.000000e+00> : vector<8xf32>
    %433 = vector.multi_reduction <add>, %432, %cst_177 [1] : vector<8x128xf32> to vector<8xf32>
    %434 = vector.shape_cast %433 : vector<8xf32> to vector<8x1xf32>
    %c148 = arith.constant 148 : index
    %c0_178 = arith.constant 0 : index
    %435 = vector.load %arg1[%c148, %c0_178] : memref<152x128xf32, #tpu.memory_space<vmem>>, vector<1x128xf32>
    %436 = vector.broadcast %435 : vector<1x128xf32> to vector<8x128xf32>
    %437 = arith.mulf %432, %436 : vector<8x128xf32>
    %cst_179 = arith.constant dense<0.000000e+00> : vector<8xf32>
    %438 = vector.multi_reduction <add>, %437, %cst_179 [1] : vector<8x128xf32> to vector<8xf32>
    %439 = vector.shape_cast %438 : vector<8xf32> to vector<8x1xf32>
    %440 = arith.subf %434, %439 : vector<8x1xf32>
    %cst_180 = arith.constant 2.500000e-01 : f32
    %441 = vector.broadcast %cst_180 : f32 to vector<8x1xf32>
    %442 = arith.mulf %440, %441 : vector<8x1xf32>
    %443 = arith.subf %439, %442 : vector<8x1xf32>
    %444 = vector.broadcast %443 : vector<8x1xf32> to vector<8x128xf32>
    %445 = arith.addf %432, %444 : vector<8x128xf32>
    %c0_181 = arith.constant 0 : index
    %c0_182 = arith.constant 0 : index
    %446 = vector.load %arg3[%c0_181, %c0_182] : memref<10x128xf32, #tpu.memory_space<vmem>>, vector<8x128xf32>
    tpu.vector_store %arg3[%c0_181, %c0_182], %445 {strides = array<i32>} : memref<10x128xf32, #tpu.memory_space<vmem>>, vector<8x128xf32>,
    %c8_183 = arith.constant 8 : index
    %c0_184 = arith.constant 0 : index
    %447 = vector.load %arg3[%c8_183, %c0_184] : memref<10x128xf32, #tpu.memory_space<vmem>>, vector<1x128xf32>
    tpu.vector_store %arg3[%c8_183, %c0_184], %424 {strides = array<i32>} : memref<10x128xf32, #tpu.memory_space<vmem>>, vector<1x128xf32>,
    %c9_185 = arith.constant 9 : index
    %c0_186 = arith.constant 0 : index
    %448 = vector.load %arg3[%c9_185, %c0_186] : memref<10x128xf32, #tpu.memory_space<vmem>>, vector<1x128xf32>
    tpu.vector_store %arg3[%c9_185, %c0_186], %422 {strides = array<i32>} : memref<10x128xf32, #tpu.memory_space<vmem>>, vector<1x128xf32>,
    return
  }
}

</mosaic_0001>

<bundles_post_ra>
// kernel: meta_learner_forward_packed.1
= control target key start
LH: loop header
LB: loop body
LE: loop exit
PB: predicated region body
PF: predicated region fallthrough
CT: control target
= control target key end

     0   :  { %8 = vsyncpa [#allocation5], 0  ;;  %s1822_s0 = inlined_call_operand.vmem [shape: f32[10,128], index: 0, kind: input, shape index: {}]   ;;  %s1823_s1 = inlined_call_operand.hbm [shape: f32[152,128], index: 1, kind: input, shape index: {}]   ;;  %s1824_s2 = inlined_call_operand.hbm [shape: f32[24,512], index: 2, kind: input, shape index: {}]   ;;  %s1825_s3 = inlined_call_operand.vmem [shape: f32[10,128], index: 3, kind: output, shape index: {}]  }
   0x1   :  { %9 = vsyncpa [#allocation7], 0  ;;  %s1615_s12 = smov [#allocation4]   ;;  %s1567_s16 = scalar_lea.hbm %s1823_s1, 2432 }
   0x2   :  { %s17_s13 = sshll.u32 %s1615_s12, 4  ;;  %p1568_p0 = scmp.ne.s32.totalorder %s1823_s1, %s1567_s16  ;;  %s18_s13 = int_to_ptr.vmem [resolvable:$true] %s17_s13 }
   0x3   :  { %p1571_p1 = scmp.lt.u32.totalorder %s1567_s16, %s1823_s1 }
   0x5   :  { %p1573_p2 = pnand %p1571_p1, %p1568_p0 }
   0x7   :  { %1576 = shalt.err (!%p1573_p2)
}
   0x8   :  { %s1577_s21 = scalar_lea.vmem %s18_s13, 2432  ;;  %p1582_p4 = scmp.lt.s32.totalorder %s18_s13, %s18_s13 }
   0x9   :  { %p1578_p3 = scmp.ne.s32.totalorder %s18_s13, %s1577_s21  ;;  %p1583_p5 = scmp.lt.s32.totalorder %s1577_s21, %s1577_s21 }
   0xb   :  { %p1584_p6 = por %p1583_p5, %p1582_p4 }
   0xd   :  { %p1585_p7 = pnand %p1584_p6, %p1578_p3 }
   0xf   :  { %1588 = shalt.err (!%p1585_p7)
}
  0x10   :  { %s1616_s22 = smov 128   ;;  %s1617_s23 = smov 8  }
  0x11   :  { %23 = dma.hbm_to_vmem [thread:$0]  %s1823_s1, 2432, %s18_s13, [#allocation5], %s1616_s22, %s1616_s22, %s1617_s23  }
  0x12   :  { %s1618_s26 = smov [#allocation6]   ;;  %s1589_s30 = scalar_lea.hbm %s1824_s2, 1536 }
  0x13   :  { %s29_s27 = sshll.u32 %s1618_s26, 4  ;;  %p1590_p8 = scmp.ne.s32.totalorder %s1824_s2, %s1589_s30  ;;  %s30_s27 = int_to_ptr.vmem [resolvable:$true] %s29_s27 }
  0x14   :  { %p1593_p9 = scmp.lt.u32.totalorder %s1589_s30, %s1824_s2 }
  0x16   :  { %p1595_p10 = pnand %p1593_p9, %p1590_p8 }
  0x18   :  { %1598 = shalt.err (!%p1595_p10)
}
  0x19   :  { %s1599_s8 = scalar_lea.vmem %s30_s27, 1536  ;;  %p1604_p12 = scmp.lt.s32.totalorder %s30_s27, %s30_s27 }
  0x1a   :  { %p1600_p11 = scmp.ne.s32.totalorder %s30_s27, %s1599_s8  ;;  %p1605_p13 = scmp.lt.s32.totalorder %s1599_s8, %s1599_s8 }
  0x1c   :  { %p1606_p0 = por %p1605_p13, %p1604_p12 }
  0x1e   :  { %p1607_p1 = pnand %p1606_p0, %p1600_p11 }
  0x20   :  { %1610 = shalt.err (!%p1607_p1)
}
  0x21   :  { %s1619_s1 = smov 512   ;;  %s1620_s9 = smov 32  }
  0x22   :  { %35 = dma.hbm_to_vmem [thread:$0]  %s1824_s2, 1536, %s30_s27, [#allocation7], %s1619_s1, %s1619_s1, %s1620_s9  }
  0x23   :  { %1611 = dma.done.wait [#allocation5], 2432  }
  0x24   :  { %1612 = vsyncadd [#allocation5], 4294964864 }
  0x25   :  { %1613 = dma.done.wait [#allocation7], 1536  }
  0x26   :  { %1614 = vsyncadd [#allocation7], 4294965760  ;;  %v1621_v0 = vmov 0.0   ;;  %vm1622_vm0 = vmmov 0   ;;  %v1623_v1 = vmov 0.0|0.0   ;;  %vm49_vm1 = vcmask 64512  }
  0x27   :  { %1408 = vmatprep.subr.mxu0 %v1621_v0  ;;  %1410 = vmatprep.mubr.msk.f32.mxu0 %vm1622_vm0, %v1621_v0  ;;  %v43_v2 = vld [vmem:[#allocation4] sm:$0xff]  ;;  %v42_v3 = vld [vmem:[%s1822_s0] sm:$0xff]  ;;  %v124_v4 = vld [vmem:[#allocation4 + $0x8] sm:$0xff]  ;;  %vm137_vm2 = vcmask 523264   ;;  %v1624_v43 = vmov 3   ;;  %v1625_v44 = vmov 1   ;;  %v306_v53 = vlaneseq }
  0x28   :  { %1456 = vmatprep.subr.bf16.mxu1 %v1623_v1  ;;  %1429 = vmatprep.mubr.msk.f32.mxu1 %vm1622_vm0, %v1621_v0  ;;  %v125_v5 = vld [vmem:[#allocation4 + $0x10] sm:$0xff]  ;;  %v126_v6 = vld [vmem:[#allocation4 + $0x18] sm:$0xff]  ;;  %v127_v7 = vld [vmem:[#allocation4 + $0x20] sm:$0xff]  ;;  %v1626_v45 = vmov 4   ;;  %v1627_v46 = vmov 2   ;;  %v1628_v47 = vmov 0  }
  0x29   :  { %1409 = vmatpush3.msra.mxu0 %v43_v2  ;;  %v1457_v8 = vpack.c.bf16 %v125_v5, %v124_v4  ;;  %v1460_v9 = vpack.c.bf16 %v127_v7, %v126_v6  ;;  %v128_v10 = vld [vmem:[#allocation4 + $0x28] sm:$0xff]  ;;  %v129_v11 = vld [vmem:[#allocation4 + $0x30] sm:$0xff]  ;;  %v130_v13 = vld [vmem:[#allocation4 + $0x38] sm:$0xff]  ;;  %1497 = vset.pattern.permute.xlu1 %v1624_v43  ;;  %v1702_v54 = vshrl.u32 %v306_v53, 7 }
  0x2a   :  { %1411 = vmatmul.mubr.msk.f32.vlgmr.msra.gmra.mrb[0].mxu0 %vm49_vm1, %v42_v3  ;;  %1468 = vmatprep.subr.bf16.mxu0 %v1623_v1  ;;  %v1463_v12 = vpack.c.bf16 %v129_v11, %v128_v10  ;;  %v131_v14 = vld [vmem:[#allocation4 + $0x40] sm:$0xff]  ;;  %v212_v16 = vld [vmem:[#allocation4 + $0x48] sm:$0xff]  ;;  %v213_v17 = vld [vmem:[#allocation4 + $0x50] sm:$0xff] }
  0x2b   :  { %1448 = vmatprep.mubr.msk.f32.mxu0 %vm1622_vm0, %v1621_v0  ;;  %1458 = vmatpush3.bf16.msra.mxu1 %v1457_v8  ;;  %v1466_v15 = vpack.c.bf16 %v131_v14, %v130_v13  ;;  %v214_v18 = vld [vmem:[#allocation4 + $0x58] sm:$0xff]  ;;  %v1469_v19 = vpack.c.bf16 %v213_v17, %v212_v16  ;;  %v215_v20 = vld [vmem:[#allocation4 + $0x60] sm:$0xff]  ;;  %v216_v22 = vld [vmem:[#allocation4 + $0x68] sm:$0xff]  ;;  %v1705_v55 = vsub.s32 0, %v1702_v54  ;;  %v1708_v56 = vsub.s32 1, %v1702_v54 }
  0x2c   :  { %1459 = vmatprep.subr.bf16.mxu1 %v1623_v1  ;;  %v1472_v21 = vpack.c.bf16 %v215_v20, %v214_v18  ;;  %v217_v23 = vld [vmem:[#allocation4 + $0x70] sm:$0xff]  ;;  %v218_v30 = vld [vmem:[#allocation4 + $0x78] sm:$0xff]  ;;  %v219_v31 = vld [vmem:[#allocation4 + $0x80] sm:$0xff]  ;;  %1495 = vset.pattern.permute.xlu0 %v1625_v44  ;;  %v1711_v57 = vsub.s32 2, %v1702_v54  ;;  %v1714_v58 = vsub.s32 3, %v1702_v54 }
  0x2d   :  { %1470 = vmatpush3.bf16.msra.mxu0 %v1469_v19  ;;  %v1475_v24 = vpack.c.bf16 %v217_v23, %v216_v22  ;;  %v1375_v25 = vld [vmem:[#allocation4 + $0x90] ss:$0 sm:$0xff]  ;;  %v1478_v32 = vpack.c.bf16 %v219_v31, %v218_v30  ;;  %v1377_v33 = vld [vmem:[#allocation4 + $0x91] ss:$0 sm:$0xff]  ;;  %v300_v38 = vld [vmem:[#allocation6 + $0x8] sm:$0xff] }
  0x2e   :  { %1471 = vmatprep.subr.bf16.mxu0 %v1623_v1  ;;  %v302_v39 = vld [vmem:[#allocation6 + $0x18] sm:$0xff]  ;;  %v299_v40 = vld [vmem:[#allocation6] sm:$0xff]  ;;  %v301_v41 = vld [vmem:[#allocation6 + $0x10] sm:$0xff] }
  0x2f   :  { %1461 = vmatpush3.bf16.msra.mxu1 %v1460_v9  ;;  %v475_v42 = vld [vmem:[%s1822_s0 + $0x8] sm:$0x1]  ;;  %v1379_v48 = vld [vmem:[#allocation4 + $0x92] ss:$0 sm:$0xff] }
  0x30   :  { %1462 = vmatprep.subr.bf16.mxu1 %v1623_v1  ;;  %575 = vperm.xlu1 %1497, %v475_v42   ;;  %v573_v59 = vld [vmem:[#allocation6 + $0x23] ss:$8 sm:$0xf]  ;;  %v511_v61 = vld [vmem:[#allocation6 + $0x21] ss:$8 sm:$0xf] }
  0x31   :  { %1473 = vmatpush3.bf16.msra.mxu0 %v1472_v21  ;;  %513 = vperm.xlu0 %1495, %v475_v42   ;;  %v604_v63 = vld [vmem:[#allocation6 + $0x24] ss:$8 sm:$0xf]  ;;  %v586_v2 = vrot.slane %v573_v59, %v1708_v56  ;;  %v590_v3 = vrot.slane %v573_v59, %v1711_v57  ;;  %v594_v4 = vrot.slane %v573_v59, %v1714_v58 }
  0x32   :  { %1474 = vmatprep.subr.bf16.mxu0 %v1623_v1  ;;  %v520_v5 = vrot.slane %v511_v61, %v1705_v55  ;;  %v524_v6 = vrot.slane %v511_v61, %v1708_v56  ;;  %v528_v7 = vrot.slane %v511_v61, %v1711_v57  ;;  %v532_v8 = vrot.slane %v511_v61, %v1714_v58 }
  0x33   :  { %1464 = vmatpush3.bf16.msra.mxu1 %v1463_v12  ;;  %v613_v9 = vrot.slane %v604_v63, %v1705_v55  ;;  %v617_v10 = vrot.slane %v604_v63, %v1708_v56  ;;  %v621_v11 = vrot.slane %v604_v63, %v1711_v57  ;;  %v625_v12 = vrot.slane %v604_v63, %v1714_v58 }
  0x34   :  { %1465 = vmatprep.subr.bf16.mxu1 %v1623_v1  ;;  %1498 = vset.pattern.permute.xlu1 %v1626_v45 }
  0x35   :  { %1476 = vmatpush3.bf16.msra.mxu0 %v1475_v24  ;;  %1496 = vset.pattern.permute.xlu0 %v1627_v46 }
  0x36   :  { %1477 = vmatprep.subr.bf16.mxu0 %v1623_v1  ;;  %606 = vperm.xlu1 %1498, %v475_v42   ;;  %v542_v1 = vld [vmem:[#allocation6 + $0x22] ss:$8 sm:$0xf] }
  0x37   :  { %1467 = vmatpush3.bf16.msra.mxu1 %v1466_v15  ;;  %544 = vperm.xlu0 %1496, %v475_v42   ;;  %v551_v13 = vrot.slane %v542_v1, %v1705_v55  ;;  %v555_v15 = vrot.slane %v542_v1, %v1708_v56  ;;  %v559_v16 = vrot.slane %v542_v1, %v1711_v57 }
  0x38   :  { %329 = vmatprep.subr.mxu1 %v300_v38  ;;  %v563_v17 = vrot.slane %v542_v1, %v1714_v58 }
  0x39   :  { %1479 = vmatpush3.bf16.msra.mxu0 %v1478_v32 }
  0x3a   :  { %400 = vmatprep.subr.mxu0 %v302_v39  ;;  %1499 = vset.pattern.permute.xlu1 %v1628_v47 }
  0x3b   :  { %1500 = vset.pattern.permute.xlu0 %v1625_v44  ;;  %482 = vperm.xlu1 %1499, %v475_v42  }
  0x3f   :  { %1501 = vset.pattern.permute.xlu1 %v1627_v46 }
  0xaf   :  { %v576_v60 = vpop.permute.xlu1 %575 }
  0xb0   :  { %v514_v62 = vpop.permute.xlu0 %513  ;;  %v600_v19 = vmul.f32 %v586_v2, %v576_v60  ;;  %v601_v20 = vmul.f32 %v590_v3, %v576_v60  ;;  %v602_v21 = vmul.f32 %v594_v4, %v576_v60  ;;  %v304_v2 = vld [vmem:[#allocation6 + $0x40] ss:$8 sm:$0xf] }
  0xb1   :  { %v537_v23 = vmul.f32 %v520_v5, %v514_v62  ;;  %v538_v24 = vmul.f32 %v524_v6, %v514_v62 }
  0xb5   :  { %v607_v14 = vpop.permute.xlu1 %606 }
  0xb6   :  { %v545_v22 = vpop.permute.xlu0 %544  ;;  %v632_v30 = vmul.f32 %v621_v11, %v607_v14  ;;  %v633_v31 = vmul.f32 %v625_v12, %v607_v14  ;;  %v313_v12 = vrot.slane %v304_v2, %v1708_v56 }
  0xb7   :  { %v568_v32 = vmul.f32 %v551_v13, %v545_v22  ;;  %v321_v13 = vrot.slane %v304_v2, %v1714_v58 }
  0xba   :  { %v483_v42 = vpop.permute.xlu1 %482 }
  0xfd   :  { %v119_v26 = vpop.f32.mrb[0].mxu0 }
  0xfe   :  { %v120_v27 = vadd.f32 %v1375_v25, %v119_v26  ;;  %v1412_v28 = vpop.f32.mrb[1].mxu0  ;;  %v539_v25 = vmul.f32 %v528_v7, %v514_v62  ;;  %v540_v26 = vmul.f32 %v532_v8, %v514_v62 }
  0xff   :  { %v630_v28 = vmul.f32 %v613_v9, %v607_v14  ;;  %v309_v9 = vrot.slane %v304_v2, %v1705_v55 }
 0x100   :  { %v123_v29 = vmax.f32 %v120_v27, 0.0  ;;  %v479_v27 = vld [vmem:[#allocation6 + $0x20] ss:$8 sm:$0xf] }
 0x101   :  { %v497_v38 = vrot.slane %v479_v27, %v1711_v57  ;;  %v501_v39 = vrot.slane %v479_v27, %v1714_v58 }
 0x102   :  { %1430 = vmatmul.mubr.msk.f32.vlgmr.msra.gmra.mrb[0].mxu1 %vm137_vm2, %v123_v29  ;;  %v631_v29 = vmul.f32 %v617_v10, %v607_v14  ;;  %v317_v10 = vrot.slane %v304_v2, %v1711_v57  ;;  %v739_v2 = vld [vmem:[#allocation6 + $0x21] ss:$8 sm:$0xf] }
 0x103   :  { %393 = vmatprep.mubr.f32.mxu1 %v1621_v0  ;;  %330 = vmatpush1.msra.mxu1 %v299_v40  ;;  %v1629_v40 = vmov 1966171168   ;;  %v508_v63 = vmul.f32 %v497_v38, %v483_v42 }
 0x104   :  { %1451 = vmatprep.subr.mxu1 %v1621_v0 }
 0x1d5   :  { %v207_v34 = vpop.f32.mrb[0].mxu1 }
 0x1d6   :  { %v208_v35 = vadd.f32 %v1377_v33, %v207_v34  ;;  %v1431_v36 = vpop.f32.mrb[1].mxu1  ;;  %v569_v33 = vmul.f32 %v555_v15, %v545_v22  ;;  %v570_v34 = vmul.f32 %v559_v16, %v545_v22 }
 0x1d7   :  { %v489_v36 = vrot.slane %v479_v27, %v1705_v55 }
 0x1d8   :  { %v211_v37 = vmax.f32 %v208_v35, 0.0  ;;  %v571_v35 = vmul.f32 %v563_v17, %v545_v22  ;;  %v665_v53 = vadd.f32 %v569_v33, %v538_v24 }
 0x1d9   :  { %v506_v61 = vmul.f32 %v489_v36, %v483_v42  ;;  %v476_v36 = vld [vmem:[%s1822_s0 + $0x9] sm:$0x1] }
 0x1da   :  { %1449 = vmatmul.mubr.msk.f32.vlgmr.msra.gmra.mrb[2].mxu0 %vm137_vm2, %v211_v37  ;;  %v493_v37 = vrot.slane %v479_v27, %v1708_v56 }
 0x1db   :  { %464 = vmatprep.mubr.f32.mxu0 %v1621_v0  ;;  %401 = vmatpush1.msra.mxu0 %v301_v41  ;;  %v641_v41 = vunpack.c.l.s4 %v1629_v40 }
 0x1dc   :  { %v507_v62 = vmul.f32 %v493_v37, %v483_v42 }
 0x1dd   :  { %v642_v1 = vunpack.c.0.s8 %v641_v41 }
 0x1de   :  { %v638_v7 = vcombine.low %v506_v61, %v507_v62  ;;  %v759_v61 = vld [vmem:[#allocation6 + $0x23] ss:$8 sm:$0xf] }
 0x1df   :  { %v645_v11 = vsub.s32 %v642_v1, %v1702_v54  ;;  %v749_v1 = vld [vmem:[#allocation6 + $0x22] ss:$8 sm:$0xf] }
 0x2ad   :  { %v294_v49 = vpop.f32.mrb[2].mxu0 }
 0x2ae   :  { %v295_v50 = vadd.f32 %v1379_v48, %v294_v49  ;;  %v1450_v51 = vpop.f32.mrb[3].mxu0  ;;  %v669_v49 = vadd.f32 %v631_v29, %v600_v19 }
 0x2af   :  { %v671_v51 = vadd.f32 %v633_v31, %v602_v21 }
 0x2b0   :  { %v298_v52 = vmax.f32 %v295_v50, 0.0  ;;  %v670_v50 = vadd.f32 %v632_v30, %v601_v20  ;;  %v673_v4 = vadd.f32 %v669_v49, %v665_v53 }
 0x2b2   :  { %1381 = vmatmul.mubr.msk.f32.vlgmr.msra.gmra.mrb[2].mxu1 %vm49_vm1, %v298_v52  ;;  %1382 = vmatmul.mubr.msk.f32.vlgmr.msra.gmra.mrb[4].mxu0 %vm49_vm1, %v298_v52  ;;  %v664_v52 = vadd.f32 %v568_v32, %v537_v23 }
 0x2b3   :  { %1453 = vmatprep.mubr.msk.f32.mxu1 %vm1622_vm0, %v1621_v0  ;;  %v582_v0 = vrot.slane %v573_v59, %v1705_v55  ;;  %v666_v59 = vadd.f32 %v570_v34, %v539_v25 }
 0x2b5   :  { %v599_v18 = vmul.f32 %v582_v0, %v576_v60  ;;  %v667_v60 = vadd.f32 %v571_v35, %v540_v26  ;;  %v509_v0 = vmul.f32 %v501_v39, %v483_v42  ;;  %v674_v5 = vadd.f32 %v670_v50, %v666_v59 }
 0x2b7   :  { %v668_v48 = vadd.f32 %v630_v28, %v599_v18  ;;  %v675_v6 = vadd.f32 %v671_v51, %v667_v60  ;;  %v639_v8 = vcombine.low %v508_v63, %v509_v0  ;;  %v646_v18 = vrot.slane %v638_v7, %v645_v11  ;;  %v769_v63 = vld [vmem:[#allocation6 + $0x24] ss:$8 sm:$0xf] }
 0x2b9   :  { %v672_v3 = vadd.f32 %v668_v48, %v664_v52  ;;  %v681_v15 = vcombine.low %v674_v5, %v675_v6  ;;  %v653_v19 = vrot.slane %v639_v8, %v645_v11 }
 0x2bb   :  { %v680_v14 = vcombine.low %v672_v3, %v673_v4  ;;  %v695_v54 = vrot.slane %v681_v15, %v645_v11  ;;  %v654_v26 = vcombine.low %v646_v18, %v653_v19 }
 0x2bd   :  { %v688_v57 = vrot.slane %v680_v14, %v645_v11  ;;  %v661_v58 = vrot.slane %v654_v26, %v645_v11 }
 0x2bf   :  { %v696_v56 = vcombine.low %v688_v57, %v695_v54 }
 0x2c1   :  { %v703_v28 = vrot.slane %v696_v56, %v645_v11 }
 0x385   :  { %v395_v16 = vpop.f32.mrb[2].mxu1  ;;  %v466_v17 = vpop.f32.mrb[4].mxu0 }
 0x386   :  { %v396_v20 = vadd.f32 %v395_v16, %v309_v9  ;;  %v467_v21 = vadd.f32 %v466_v17, %v317_v10  ;;  %v397_v22 = vpop.f32.mrb[3].mxu1  ;;  %v468_v23 = vpop.f32.mrb[5].mxu0  ;;  %v728_v9 = vld [vmem:[#allocation6 + $0x20] ss:$8 sm:$0xf] }
 0x387   :  { %v398_v24 = vadd.f32 %v397_v22, %v313_v12  ;;  %v469_v25 = vadd.f32 %v468_v23, %v321_v13 }
 0x388   :  { %471 = vst [vmem:[#allocation2] sm:$0xff] %v396_v20  ;;  %473 = vst [vmem:[#allocation2 + $0x10] sm:$0xff] %v467_v21 }
 0x389   :  { %472 = vst [vmem:[#allocation2 + $0x8] sm:$0xff] %v398_v24  ;;  %474 = vst [vmem:[#allocation2 + $0x18] sm:$0xff] %v469_v25 }
 0x390   :  { %v477_v27 = vld [vmem:[#allocation2] ss:$8 sm:$0xf]  ;;  %v727_v15 = vld [vmem:[#allocation2 + $0x1] ss:$8 sm:$0xf] }
 0x391   :  { %v663_v29 = vadd.f32 %v661_v58, %v477_v27 }
 0x393   :  { %v705_v30 = vadd.f32 %v703_v28, %v663_v29 }
 0x395   :  { %1535 = vtanh.f32 %v705_v30 }
 0x39f   :  { %v1536_v31 = vpop.eup %1535 }
 0x3a0   :  { %v707_v32 = vmul.f32 0.5, %v1536_v31  ;;  %v710_v33 = vrot.slane %v1536_v31, 1  ;;  %v719_v38 = vrot.slane %v1536_v31, 2  ;;  %v714_v42 = vrot.slane %v1536_v31, 3 }
 0x3a2   :  { %v708_v34 = vadd.f32 0.5, %v707_v32  ;;  %v712_v35 = vmul.f32 0.5, %v710_v33  ;;  %v716_v48 = vmul.f32 0.5, %v714_v42  ;;  %v847_v42 = vld [vmem:[#allocation6 + $0x24] ss:$8 sm:$0xf] }
 0x3a4   :  { %v713_v37 = vadd.f32 0.5, %v712_v35  ;;  %v721_v40 = vmul.f32 %v719_v38, %v708_v34  ;;  %v717_v49 = vadd.f32 0.5, %v716_v48  ;;  %v806_v38 = vld [vmem:[#allocation6 + $0x20] ss:$8 sm:$0xf] }
 0x3a6   :  { %v718_v39 = vmul.f32 %v713_v37, %v476_v36  ;;  %v827_v36 = vld [vmem:[#allocation6 + $0x22] ss:$8 sm:$0xf]  ;;  %v817_v37 = vld [vmem:[#allocation6 + $0x21] ss:$8 sm:$0xf] }
 0x3a8   :  { %v722_v41 = vadd.f32 %v721_v40, %v718_v39 }
 0x3aa   :  { %1537 = vtanh.f32 %v722_v41 }
 0x3b4   :  { %v1538_v50 = vpop.eup %1537 }
 0x3b5   :  { %v724_v51 = vmul.f32 %v1538_v50, %v717_v49 }
 0x3b7   :  { %751 = vperm.xlu1 %1501, %v724_v51   ;;  %725 = vst [vmem:[#allocation3] sm:$0x1] %v724_v51  ;;  %741 = vperm.xlu0 %1500, %v724_v51  }
 0x3bb   :  { %1502 = vset.pattern.permute.xlu1 %v1624_v43  ;;  %1503 = vset.pattern.permute.xlu0 %v1626_v45 }
 0x3bc   :  { %761 = vperm.xlu1 %1502, %v724_v51   ;;  %771 = vperm.xlu0 %1503, %v724_v51  }
 0x3c0   :  { %1504 = vset.pattern.permute.xlu1 %v1628_v47  ;;  %1506 = vset.pattern.permute.xlu0 %v1627_v46 }
 0x3c1   :  { %731 = vperm.xlu1 %1504, %v724_v51  }
 0x3c5   :  { %1505 = vset.pattern.permute.xlu1 %v1625_v44 }
 0x436   :  { %v752_v52 = vpop.permute.xlu1 %751  ;;  %v742_v53 = vpop.permute.xlu0 %741 }
 0x437   :  { %v757_v59 = vrot.slane %v752_v52, %v1705_v55  ;;  %v747_v60 = vrot.slane %v742_v53, %v1705_v55 }
 0x439   :  { %v758_v7 = vmul.f32 %v757_v59, %v749_v1  ;;  %v748_v8 = vmul.f32 %v747_v60, %v739_v2 }
 0x43b   :  { %v762_v62 = vpop.permute.xlu1 %761  ;;  %v772_v0 = vpop.permute.xlu0 %771  ;;  %v780_v13 = vadd.f32 %v758_v7, %v748_v8 }
 0x43c   :  { %v767_v3 = vrot.slane %v762_v62, %v1705_v55  ;;  %v777_v4 = vrot.slane %v772_v0, %v1705_v55  ;;  %v805_v62 = vld [vmem:[#allocation2 + $0x2] ss:$8 sm:$0xf] }
 0x43e   :  { %v768_v5 = vmul.f32 %v767_v3, %v759_v61  ;;  %v778_v6 = vmul.f32 %v777_v4, %v769_v63 }
 0x440   :  { %v732_v10 = vpop.permute.xlu1 %731  ;;  %v781_v11 = vadd.f32 %v778_v6, %v768_v5 }
 0x441   :  { %v737_v12 = vrot.slane %v732_v10, %v1705_v55 }
 0x442   :  { %v782_v16 = vadd.f32 %v781_v11, %v780_v13 }
 0x443   :  { %v738_v14 = vmul.f32 %v737_v12, %v728_v9 }
 0x445   :  { %v779_v17 = vadd.f32 %v738_v14, %v727_v15 }
 0x447   :  { %v783_v18 = vadd.f32 %v782_v16, %v779_v17 }
 0x449   :  { %1539 = vtanh.f32 %v783_v18 }
 0x453   :  { %v1540_v19 = vpop.eup %1539 }
 0x454   :  { %v785_v20 = vmul.f32 0.5, %v1540_v19  ;;  %v788_v21 = vrot.slane %v1540_v19, 1  ;;  %v797_v25 = vrot.slane %v1540_v19, 2  ;;  %v792_v56 = vrot.slane %v1540_v19, 3 }
 0x456   :  { %v786_v22 = vadd.f32 0.5, %v785_v20  ;;  %v790_v23 = vmul.f32 0.5, %v788_v21  ;;  %v794_v58 = vmul.f32 0.5, %v792_v56 }
 0x458   :  { %v791_v24 = vadd.f32 0.5, %v790_v23  ;;  %v799_v54 = vmul.f32 %v797_v25, %v786_v22  ;;  %v795_v27 = vadd.f32 0.5, %v794_v58  ;;  %v925_v22 = vld [vmem:[#allocation6 + $0x24] ss:$8 sm:$0xf] }
 0x459   :  { %v905_v25 = vld [vmem:[#allocation6 + $0x22] ss:$8 sm:$0xf] }
 0x45a   :  { %v796_v57 = vmul.f32 %v791_v24, %v722_v41  ;;  %v837_v41 = vld [vmem:[#allocation6 + $0x23] ss:$8 sm:$0xf] }
 0x45b   :  { %v915_v24 = vld [vmem:[#allocation6 + $0x23] ss:$8 sm:$0xf] }
 0x45c   :  { %v800_v26 = vadd.f32 %v799_v54, %v796_v57 }
 0x45e   :  { %1541 = vtanh.f32 %v800_v26 }
 0x468   :  { %v1542_v28 = vpop.eup %1541 }
 0x469   :  { %v802_v29 = vmul.f32 %v1542_v28, %v795_v27  ;;  %v884_v28 = vld [vmem:[#allocation6 + $0x20] ss:$8 sm:$0xf] }
 0x46b   :  { %829 = vperm.xlu0 %1506, %v802_v29   ;;  %803 = vst [vmem:[#allocation3 + $0x1] sm:$0x1] %v802_v29  ;;  %819 = vperm.xlu1 %1505, %v802_v29  }
 0x46f   :  { %1509 = vset.pattern.permute.xlu0 %v1628_v47  ;;  %1507 = vset.pattern.permute.xlu1 %v1624_v43 }
 0x470   :  { %809 = vperm.xlu0 %1509, %v802_v29   ;;  %839 = vperm.xlu1 %1507, %v802_v29  }
 0x474   :  { %1508 = vset.pattern.permute.xlu1 %v1626_v45  ;;  %1512 = vset.pattern.permute.xlu0 %v1624_v43 }
 0x475   :  { %849 = vperm.xlu1 %1508, %v802_v29  }
 0x479   :  { %1510 = vset.pattern.permute.xlu1 %v1625_v44 }
 0x4ea   :  { %v830_v30 = vpop.permute.xlu0 %829  ;;  %v820_v31 = vpop.permute.xlu1 %819 }
 0x4eb   :  { %v835_v34 = vrot.slane %v830_v30, %v1705_v55  ;;  %v825_v35 = vrot.slane %v820_v31, %v1705_v55 }
 0x4ed   :  { %v836_v49 = vmul.f32 %v835_v34, %v827_v36  ;;  %v826_v50 = vmul.f32 %v825_v35, %v817_v37  ;;  %v883_v35 = vld [vmem:[#allocation2 + $0x3] ss:$8 sm:$0xf] }
 0x4ef   :  { %v840_v32 = vpop.permute.xlu1 %839  ;;  %v810_v33 = vpop.permute.xlu0 %809  ;;  %v858_v60 = vadd.f32 %v836_v49, %v826_v50 }
 0x4f0   :  { %v815_v39 = vrot.slane %v810_v33, %v1705_v55  ;;  %v845_v40 = vrot.slane %v840_v32, %v1705_v55 }
 0x4f2   :  { %v816_v52 = vmul.f32 %v815_v39, %v806_v38  ;;  %v846_v53 = vmul.f32 %v845_v40, %v837_v41 }
 0x4f4   :  { %v850_v48 = vpop.permute.xlu1 %849  ;;  %v857_v63 = vadd.f32 %v816_v52, %v805_v62 }
 0x4f5   :  { %v855_v51 = vrot.slane %v850_v48, %v1705_v55 }
 0x4f7   :  { %v856_v59 = vmul.f32 %v855_v51, %v847_v42 }
 0x4f9   :  { %v859_v61 = vadd.f32 %v856_v59, %v846_v53 }
 0x4fb   :  { %v860_v0 = vadd.f32 %v859_v61, %v858_v60 }
 0x4fd   :  { %v861_v1 = vadd.f32 %v860_v0, %v857_v63 }
 0x4ff   :  { %1543 = vtanh.f32 %v861_v1 }
 0x509   :  { %v1544_v2 = vpop.eup %1543 }
 0x50a   :  { %v863_v3 = vmul.f32 0.5, %v1544_v2  ;;  %v866_v4 = vrot.slane %v1544_v2, 1  ;;  %v875_v8 = vrot.slane %v1544_v2, 2  ;;  %v870_v12 = vrot.slane %v1544_v2, 3 }
 0x50c   :  { %v864_v5 = vadd.f32 0.5, %v863_v3  ;;  %v868_v6 = vmul.f32 0.5, %v866_v4  ;;  %v872_v13 = vmul.f32 0.5, %v870_v12  ;;  %v993_v4 = vld [vmem:[#allocation6 + $0x23] ss:$8 sm:$0xf] }
 0x50e   :  { %v869_v7 = vadd.f32 0.5, %v868_v6  ;;  %v877_v10 = vmul.f32 %v875_v8, %v864_v5  ;;  %v873_v14 = vadd.f32 0.5, %v872_v13  ;;  %v1003_v6 = vld [vmem:[#allocation6 + $0x24] ss:$8 sm:$0xf] }
 0x50f   :  { %v983_v8 = vld [vmem:[#allocation6 + $0x22] ss:$8 sm:$0xf] }
 0x510   :  { %v874_v9 = vmul.f32 %v869_v7, %v800_v26  ;;  %v895_v26 = vld [vmem:[#allocation6 + $0x21] ss:$8 sm:$0xf] }
 0x512   :  { %v878_v11 = vadd.f32 %v877_v10, %v874_v9  ;;  %v973_v9 = vld [vmem:[#allocation6 + $0x21] ss:$8 sm:$0xf] }
 0x514   :  { %1545 = vtanh.f32 %v878_v11 }
 0x51e   :  { %v1546_v15 = vpop.eup %1545 }
 0x51f   :  { %v880_v16 = vmul.f32 %v1546_v15, %v873_v14 }
 0x521   :  { %917 = vperm.xlu0 %1512, %v880_v16   ;;  %881 = vst [vmem:[#allocation3 + $0x2] sm:$0x1] %v880_v16  ;;  %897 = vperm.xlu1 %1510, %v880_v16  }
 0x525   :  { %1511 = vset.pattern.permute.xlu1 %v1627_v46  ;;  %1515 = vset.pattern.permute.xlu0 %v1625_v44 }
 0x526   :  { %907 = vperm.xlu1 %1511, %v880_v16  }
 0x52a   :  { %1513 = vset.pattern.permute.xlu1 %v1626_v45 }
 0x52b   :  { %927 = vperm.xlu1 %1513, %v880_v16  }
 0x52f   :  { %1514 = vset.pattern.permute.xlu1 %v1628_v47 }
 0x530   :  { %887 = vperm.xlu1 %1514, %v880_v16   ;;  %v962_v16 = vld [vmem:[#allocation6 + $0x20] ss:$8 sm:$0xf] }
 0x534   :  { %1516 = vset.pattern.permute.xlu1 %v1627_v46 }
 0x5a0   :  { %v898_v17 = vpop.permute.xlu1 %897  ;;  %v918_v19 = vpop.permute.xlu0 %917 }
 0x5a1   :  { %v923_v20 = vrot.slane %v918_v19, %v1705_v55  ;;  %v903_v54 = vrot.slane %v898_v17, %v1705_v55 }
 0x5a3   :  { %v924_v58 = vmul.f32 %v923_v20, %v915_v24  ;;  %v904_v30 = vmul.f32 %v903_v54, %v895_v26 }
 0x5a5   :  { %v908_v18 = vpop.permute.xlu1 %907 }
 0x5a6   :  { %v913_v21 = vrot.slane %v908_v18, %v1705_v55 }
 0x5a8   :  { %v914_v27 = vmul.f32 %v913_v21, %v905_v25 }
 0x5aa   :  { %v928_v23 = vpop.permute.xlu1 %927  ;;  %v936_v33 = vadd.f32 %v914_v27, %v904_v30 }
 0x5ab   :  { %v933_v57 = vrot.slane %v928_v23, %v1705_v55 }
 0x5ad   :  { %v934_v56 = vmul.f32 %v933_v57, %v925_v22  ;;  %v961_v22 = vld [vmem:[#allocation2 + $0x4] ss:$8 sm:$0xf] }
 0x5af   :  { %v888_v29 = vpop.permute.xlu1 %887  ;;  %v937_v31 = vadd.f32 %v934_v56, %v924_v58 }
 0x5b0   :  { %v893_v32 = vrot.slane %v888_v29, %v1705_v55 }
 0x5b1   :  { %v938_v36 = vadd.f32 %v937_v31, %v936_v33 }
 0x5b2   :  { %v894_v34 = vmul.f32 %v893_v32, %v884_v28 }
 0x5b4   :  { %v935_v37 = vadd.f32 %v894_v34, %v883_v35 }
 0x5b6   :  { %v939_v38 = vadd.f32 %v938_v36, %v935_v37 }
 0x5b8   :  { %1547 = vtanh.f32 %v939_v38 }
 0x5c2   :  { %v1548_v39 = vpop.eup %1547 }
 0x5c3   :  { %v941_v40 = vmul.f32 0.5, %v1548_v39  ;;  %v944_v41 = vrot.slane %v1548_v39, 1  ;;  %v953_v50 = vrot.slane %v1548_v39, 2  ;;  %v948_v59 = vrot.slane %v1548_v39, 3 }
 0x5c5   :  { %v942_v42 = vadd.f32 0.5, %v941_v40  ;;  %v946_v48 = vmul.f32 0.5, %v944_v41  ;;  %v950_v60 = vmul.f32 0.5, %v948_v59  ;;  %v1081_v59 = vld [vmem:[#allocation6 + $0x24] ss:$8 sm:$0xf] }
 0x5c7   :  { %v947_v49 = vadd.f32 0.5, %v946_v48  ;;  %v955_v52 = vmul.f32 %v953_v50, %v942_v42  ;;  %v951_v61 = vadd.f32 0.5, %v950_v60  ;;  %v1061_v48 = vld [vmem:[#allocation6 + $0x22] ss:$8 sm:$0xf] }
 0x5c8   :  { %v1040_v50 = vld [vmem:[#allocation6 + $0x20] ss:$8 sm:$0xf] }
 0x5c9   :  { %v952_v51 = vmul.f32 %v947_v49, %v878_v11  ;;  %v1051_v49 = vld [vmem:[#allocation6 + $0x21] ss:$8 sm:$0xf] }
 0x5cb   :  { %v956_v53 = vadd.f32 %v955_v52, %v952_v51 }
 0x5cd   :  { %1549 = vtanh.f32 %v956_v53 }
 0x5d7   :  { %v1550_v62 = vpop.eup %1549 }
 0x5d8   :  { %v958_v63 = vmul.f32 %v1550_v62, %v951_v61 }
 0x5da   :  { %985 = vperm.xlu1 %1516, %v958_v63   ;;  %959 = vst [vmem:[#allocation3 + $0x3] sm:$0x1] %v958_v63  ;;  %975 = vperm.xlu0 %1515, %v958_v63  }
 0x5de   :  { %1517 = vset.pattern.permute.xlu1 %v1624_v43  ;;  %1518 = vset.pattern.permute.xlu0 %v1626_v45 }
 0x5df   :  { %995 = vperm.xlu1 %1517, %v958_v63   ;;  %1005 = vperm.xlu0 %1518, %v958_v63  }
 0x5e3   :  { %1519 = vset.pattern.permute.xlu1 %v1628_v47  ;;  %1521 = vset.pattern.permute.xlu0 %v1627_v46 }
 0x5e4   :  { %965 = vperm.xlu1 %1519, %v958_v63  }
 0x5e8   :  { %1520 = vset.pattern.permute.xlu1 %v1625_v44 }
 0x659   :  { %v986_v0 = vpop.permute.xlu1 %985  ;;  %v976_v1 = vpop.permute.xlu0 %975 }
 0x65a   :  { %v991_v2 = vrot.slane %v986_v0, %v1705_v55  ;;  %v981_v3 = vrot.slane %v976_v1, %v1705_v55 }
 0x65c   :  { %v992_v14 = vmul.f32 %v991_v2, %v983_v8  ;;  %v982_v15 = vmul.f32 %v981_v3, %v973_v9 }
 0x65e   :  { %v996_v5 = vpop.permute.xlu1 %995  ;;  %v1006_v7 = vpop.permute.xlu0 %1005  ;;  %v1014_v20 = vadd.f32 %v992_v14, %v982_v15 }
 0x65f   :  { %v1001_v10 = vrot.slane %v996_v5, %v1705_v55  ;;  %v1011_v11 = vrot.slane %v1006_v7, %v1705_v55  ;;  %v1039_v5 = vld [vmem:[#allocation2 + $0x5] ss:$8 sm:$0xf] }
 0x661   :  { %v1002_v12 = vmul.f32 %v1001_v10, %v993_v4  ;;  %v1012_v13 = vmul.f32 %v1011_v11, %v1003_v6 }
 0x663   :  { %v966_v17 = vpop.permute.xlu1 %965  ;;  %v1015_v18 = vadd.f32 %v1012_v13, %v1002_v12 }
 0x664   :  { %v971_v19 = vrot.slane %v966_v17, %v1705_v55 }
 0x665   :  { %v1016_v23 = vadd.f32 %v1015_v18, %v1014_v20 }
 0x666   :  { %v972_v21 = vmul.f32 %v971_v19, %v962_v16 }
 0x668   :  { %v1013_v24 = vadd.f32 %v972_v21, %v961_v22 }
 0x66a   :  { %v1017_v25 = vadd.f32 %v1016_v23, %v1013_v24 }
 0x66c   :  { %1551 = vtanh.f32 %v1017_v25 }
 0x676   :  { %v1552_v57 = vpop.eup %1551 }
 0x677   :  { %v1019_v54 = vmul.f32 0.5, %v1552_v57  ;;  %v1022_v26 = vrot.slane %v1552_v57, 1  ;;  %v1031_v28 = vrot.slane %v1552_v57, 2  ;;  %v1026_v32 = vrot.slane %v1552_v57, 3 }
 0x679   :  { %v1020_v56 = vadd.f32 0.5, %v1019_v54  ;;  %v1024_v58 = vmul.f32 0.5, %v1022_v26  ;;  %v1028_v33 = vmul.f32 0.5, %v1026_v32 }
 0x67b   :  { %v1025_v27 = vadd.f32 0.5, %v1024_v58  ;;  %v1033_v30 = vmul.f32 %v1031_v28, %v1020_v56  ;;  %v1029_v34 = vadd.f32 0.5, %v1028_v33  ;;  %v1159_v56 = vld [vmem:[#allocation6 + $0x24] ss:$8 sm:$0xf] }
 0x67d   :  { %v1030_v29 = vmul.f32 %v1025_v27, %v956_v53  ;;  %v1071_v53 = vld [vmem:[#allocation6 + $0x23] ss:$8 sm:$0xf] }
 0x67e   :  { %v1149_v27 = vld [vmem:[#allocation6 + $0x23] ss:$8 sm:$0xf] }
 0x67f   :  { %v1034_v31 = vadd.f32 %v1033_v30, %v1030_v29  ;;  %v1129_v30 = vld [vmem:[#allocation6 + $0x21] ss:$8 sm:$0xf] }
 0x681   :  { %1553 = vtanh.f32 %v1034_v31 }
 0x68b   :  { %v1554_v35 = vpop.eup %1553 }
 0x68c   :  { %v1036_v36 = vmul.f32 %v1554_v35, %v1029_v34 }
 0x68e   :  { %1063 = vperm.xlu0 %1521, %v1036_v36   ;;  %1037 = vst [vmem:[#allocation3 + $0x4] sm:$0x1] %v1036_v36  ;;  %1053 = vperm.xlu1 %1520, %v1036_v36  }
 0x692   :  { %1524 = vset.pattern.permute.xlu0 %v1628_v47  ;;  %1522 = vset.pattern.permute.xlu1 %v1624_v43 }
 0x693   :  { %1043 = vperm.xlu0 %1524, %v1036_v36   ;;  %1073 = vperm.xlu1 %1522, %v1036_v36  }
 0x697   :  { %1523 = vset.pattern.permute.xlu1 %v1626_v45  ;;  %1527 = vset.pattern.permute.xlu0 %v1624_v43 }
 0x698   :  { %1083 = vperm.xlu1 %1523, %v1036_v36  }
 0x69c   :  { %1525 = vset.pattern.permute.xlu1 %v1625_v44 }
 0x70d   :  { %v1064_v37 = vpop.permute.xlu0 %1063  ;;  %v1054_v38 = vpop.permute.xlu1 %1053 }
 0x70e   :  { %v1069_v41 = vrot.slane %v1064_v37, %v1705_v55  ;;  %v1059_v42 = vrot.slane %v1054_v38, %v1705_v55 }
 0x710   :  { %v1070_v61 = vmul.f32 %v1069_v41, %v1061_v48  ;;  %v1060_v62 = vmul.f32 %v1059_v42, %v1051_v49 }
 0x712   :  { %v1074_v39 = vpop.permute.xlu1 %1073  ;;  %v1044_v40 = vpop.permute.xlu0 %1043  ;;  %v1092_v3 = vadd.f32 %v1070_v61, %v1060_v62 }
 0x713   :  { %v1049_v51 = vrot.slane %v1044_v40, %v1705_v55  ;;  %v1079_v52 = vrot.slane %v1074_v39, %v1705_v55  ;;  %v1117_v40 = vld [vmem:[#allocation2 + $0x6] ss:$8 sm:$0xf] }
 0x715   :  { %v1050_v0 = vmul.f32 %v1049_v51, %v1040_v50  ;;  %v1080_v1 = vmul.f32 %v1079_v52, %v1071_v53 }
 0x717   :  { %v1084_v60 = vpop.permute.xlu1 %1083  ;;  %v1091_v6 = vadd.f32 %v1050_v0, %v1039_v5  ;;  %v1273_v5 = vld [vmem:[#allocation4 + $0x88] sm:$0xff] }
 0x718   :  { %v1089_v63 = vrot.slane %v1084_v60, %v1705_v55  ;;  %1452 = vmatpush3.msra.mxu1 %v1273_v5 }
 0x71a   :  { %v1090_v2 = vmul.f32 %v1089_v63, %v1081_v59 }
 0x71c   :  { %v1093_v4 = vadd.f32 %v1090_v2, %v1080_v1 }
 0x71e   :  { %v1094_v7 = vadd.f32 %v1093_v4, %v1092_v3 }
 0x720   :  { %v1095_v8 = vadd.f32 %v1094_v7, %v1091_v6 }
 0x722   :  { %1555 = vtanh.f32 %v1095_v8 }
 0x72c   :  { %v1556_v9 = vpop.eup %1555 }
 0x72d   :  { %v1097_v10 = vmul.f32 0.5, %v1556_v9  ;;  %v1100_v11 = vrot.slane %v1556_v9, 1  ;;  %v1109_v15 = vrot.slane %v1556_v9, 2  ;;  %v1104_v19 = vrot.slane %v1556_v9, 3 }
 0x72f   :  { %v1098_v12 = vadd.f32 0.5, %v1097_v10  ;;  %v1102_v13 = vmul.f32 0.5, %v1100_v11  ;;  %v1106_v20 = vmul.f32 0.5, %v1104_v19  ;;  %v1227_v10 = vld [vmem:[#allocation6 + $0x23] ss:$8 sm:$0xf] }
 0x730   :  { %v1196_v19 = vld [vmem:[#allocation6 + $0x20] ss:$8 sm:$0xf] }
 0x731   :  { %v1103_v14 = vadd.f32 0.5, %v1102_v13  ;;  %v1111_v17 = vmul.f32 %v1109_v15, %v1098_v12  ;;  %v1107_v21 = vadd.f32 0.5, %v1106_v20  ;;  %v1237_v12 = vld [vmem:[#allocation6 + $0x24] ss:$8 sm:$0xf] }
 0x733   :  { %v1108_v16 = vmul.f32 %v1103_v14, %v1034_v31  ;;  %v1207_v14 = vld [vmem:[#allocation6 + $0x21] ss:$8 sm:$0xf] }
 0x735   :  { %v1112_v18 = vadd.f32 %v1111_v17, %v1108_v16 }
 0x737   :  { %1557 = vtanh.f32 %v1112_v18 }
 0x741   :  { %v1558_v22 = vpop.eup %1557 }
 0x742   :  { %v1114_v23 = vmul.f32 %v1558_v22, %v1107_v21 }
 0x744   :  { %1151 = vperm.xlu0 %1527, %v1114_v23   ;;  %1115 = vst [vmem:[#allocation3 + $0x5] sm:$0x1] %v1114_v23  ;;  %1131 = vperm.xlu1 %1525, %v1114_v23  }
 0x748   :  { %1526 = vset.pattern.permute.xlu1 %v1627_v46  ;;  %1530 = vset.pattern.permute.xlu0 %v1625_v44  ;;  %v1139_v44 = vld [vmem:[#allocation6 + $0x22] ss:$8 sm:$0xf] }
 0x749   :  { %1141 = vperm.xlu1 %1526, %v1114_v23  }
 0x74d   :  { %1528 = vset.pattern.permute.xlu1 %v1626_v45 }
 0x74e   :  { %1161 = vperm.xlu1 %1528, %v1114_v23  }
 0x752   :  { %1529 = vset.pattern.permute.xlu1 %v1628_v47 }
 0x753   :  { %1121 = vperm.xlu1 %1529, %v1114_v23  }
 0x757   :  { %1531 = vset.pattern.permute.xlu1 %v1627_v46  ;;  %v1118_v46 = vld [vmem:[#allocation6 + $0x20] ss:$8 sm:$0xf] }
 0x7c3   :  { %v1132_v24 = vpop.permute.xlu1 %1131  ;;  %v1152_v57 = vpop.permute.xlu0 %1151 }
 0x7c4   :  { %v1157_v54 = vrot.slane %v1152_v57, %v1705_v55  ;;  %v1137_v29 = vrot.slane %v1132_v24, %v1705_v55 }
 0x7c6   :  { %v1158_v32 = vmul.f32 %v1157_v54, %v1149_v27  ;;  %v1138_v35 = vmul.f32 %v1137_v29, %v1129_v30 }
 0x7c8   :  { %v1142_v25 = vpop.permute.xlu1 %1141 }
 0x7c9   :  { %v1147_v26 = vrot.slane %v1142_v25, %v1705_v55  ;;  %v1195_v25 = vld [vmem:[#allocation2 + $0x7] ss:$8 sm:$0xf] }
 0x7cb   :  { %v1148_v33 = vmul.f32 %v1147_v26, %v1139_v44 }
 0x7cd   :  { %v1162_v58 = vpop.permute.xlu1 %1161  ;;  %v1170_v38 = vadd.f32 %v1148_v33, %v1138_v35 }
 0x7ce   :  { %v1167_v28 = vrot.slane %v1162_v58, %v1705_v55 }
 0x7d0   :  { %v1168_v31 = vmul.f32 %v1167_v28, %v1159_v56 }
 0x7d2   :  { %v1122_v34 = vpop.permute.xlu1 %1121  ;;  %v1171_v36 = vadd.f32 %v1168_v31, %v1158_v32 }
 0x7d3   :  { %v1127_v37 = vrot.slane %v1122_v34, %v1705_v55 }
 0x7d4   :  { %v1172_v41 = vadd.f32 %v1171_v36, %v1170_v38  ;;  %v1383_v38 = vld [vmem:[#allocation4 + $0x93] ss:$0 sm:$0xff] }
 0x7d5   :  { %v1128_v39 = vmul.f32 %v1127_v37, %v1118_v46 }
 0x7d7   :  { %v1169_v42 = vadd.f32 %v1128_v39, %v1117_v40  ;;  %v1385_v40 = vld [vmem:[#allocation4 + $0x94] ss:$0 sm:$0xff] }
 0x7d9   :  { %v1173_v48 = vadd.f32 %v1172_v41, %v1169_v42 }
 0x7db   :  { %1559 = vtanh.f32 %v1173_v48 }
 0x7e5   :  { %v1560_v49 = vpop.eup %1559 }
 0x7e6   :  { %v1175_v50 = vmul.f32 0.5, %v1560_v49  ;;  %v1178_v51 = vrot.slane %v1560_v49, 1  ;;  %v1187_v60 = vrot.slane %v1560_v49, 2  ;;  %v1182_v0 = vrot.slane %v1560_v49, 3 }
 0x7e8   :  { %v1176_v52 = vadd.f32 0.5, %v1175_v50  ;;  %v1180_v53 = vmul.f32 0.5, %v1178_v51  ;;  %v1184_v1 = vmul.f32 0.5, %v1182_v0 }
 0x7ea   :  { %v1181_v59 = vadd.f32 0.5, %v1180_v53  ;;  %v1189_v62 = vmul.f32 %v1187_v60, %v1176_v52  ;;  %v1185_v2 = vadd.f32 0.5, %v1184_v1 }
 0x7ec   :  { %v1186_v61 = vmul.f32 %v1181_v59, %v1112_v18 }
 0x7ee   :  { %v1190_v63 = vadd.f32 %v1189_v62, %v1186_v61 }
 0x7f0   :  { %1561 = vtanh.f32 %v1190_v63 }
 0x7fa   :  { %v1562_v3 = vpop.eup %1561 }
 0x7fb   :  { %v1192_v4 = vmul.f32 %v1562_v3, %v1185_v2 }
 0x7fd   :  { %1219 = vperm.xlu1 %1531, %v1192_v4   ;;  %1193 = vst [vmem:[#allocation3 + $0x6] sm:$0x1] %v1192_v4  ;;  %1209 = vperm.xlu0 %1530, %v1192_v4  }
 0x801   :  { %1532 = vset.pattern.permute.xlu1 %v1624_v43  ;;  %1533 = vset.pattern.permute.xlu0 %v1626_v45  ;;  %v1217_v43 = vld [vmem:[#allocation6 + $0x22] ss:$8 sm:$0xf] }
 0x802   :  { %1229 = vperm.xlu1 %1532, %v1192_v4   ;;  %1239 = vperm.xlu0 %1533, %v1192_v4  }
 0x806   :  { %1534 = vset.pattern.permute.xlu1 %v1628_v47 }
 0x807   :  { %1199 = vperm.xlu1 %1534, %v1192_v4  }
 0x87c   :  { %v1220_v6 = vpop.permute.xlu1 %1219  ;;  %v1210_v7 = vpop.permute.xlu0 %1209 }
 0x87d   :  { %v1225_v8 = vrot.slane %v1220_v6, %v1705_v55  ;;  %v1215_v9 = vrot.slane %v1210_v7, %v1705_v55 }
 0x87f   :  { %v1226_v17 = vmul.f32 %v1225_v8, %v1217_v43  ;;  %v1216_v18 = vmul.f32 %v1215_v9, %v1207_v14 }
 0x881   :  { %v1230_v11 = vpop.permute.xlu1 %1229  ;;  %v1240_v13 = vpop.permute.xlu0 %1239  ;;  %v1248_v23 = vadd.f32 %v1226_v17, %v1216_v18 }
 0x882   :  { %v1235_v45 = vrot.slane %v1230_v11, %v1705_v55  ;;  %v1245_v15 = vrot.slane %v1240_v13, %v1705_v55 }
 0x884   :  { %v1236_v47 = vmul.f32 %v1235_v45, %v1227_v10  ;;  %v1246_v16 = vmul.f32 %v1245_v15, %v1237_v12 }
 0x886   :  { %v1200_v20 = vpop.permute.xlu1 %1199  ;;  %v1249_v21 = vadd.f32 %v1246_v16, %v1236_v47 }
 0x887   :  { %v1205_v22 = vrot.slane %v1200_v20, %v1705_v55 }
 0x888   :  { %v1250_v57 = vadd.f32 %v1249_v21, %v1248_v23 }
 0x889   :  { %v1206_v24 = vmul.f32 %v1205_v22, %v1196_v19 }
 0x88b   :  { %v1247_v54 = vadd.f32 %v1206_v24, %v1195_v25 }
 0x88d   :  { %v1251_v26 = vadd.f32 %v1250_v57, %v1247_v54 }
 0x88f   :  { %1563 = vtanh.f32 %v1251_v26 }
 0x899   :  { %v1564_v56 = vpop.eup %1563 }
 0x89a   :  { %v1253_v58 = vmul.f32 0.5, %v1564_v56  ;;  %v1256_v27 = vrot.slane %v1564_v56, 1  ;;  %v1265_v30 = vrot.slane %v1564_v56, 2  ;;  %v1260_v55 = vrot.slane %v1564_v56, 3 }
 0x89c   :  { %v1254_v44 = vadd.f32 0.5, %v1253_v58  ;;  %v1258_v28 = vmul.f32 0.5, %v1256_v27  ;;  %v1262_v46 = vmul.f32 0.5, %v1260_v55 }
 0x89e   :  { %v1259_v29 = vadd.f32 0.5, %v1258_v28  ;;  %v1267_v32 = vmul.f32 %v1265_v30, %v1254_v44  ;;  %v1263_v34 = vadd.f32 0.5, %v1262_v46 }
 0x8a0   :  { %v1264_v31 = vmul.f32 %v1259_v29, %v1190_v63 }
 0x8a2   :  { %v1268_v33 = vadd.f32 %v1267_v32, %v1264_v31 }
 0x8a4   :  { %1565 = vtanh.f32 %v1268_v33  ;;  %1368 = vst [vmem:[%s1825_s3 + $0x9] sm:$0x1] %v1268_v33 }
 0x8ae   :  { %v1566_v35 = vpop.eup %1565 }
 0x8af   :  { %v1270_v36 = vmul.f32 %v1566_v35, %v1263_v34 }
 0x8b1   :  { %1271 = vst [vmem:[#allocation3 + $0x7] sm:$0x1] %v1270_v36  ;;  %1367 = vst [vmem:[%s1825_s3 + $0x8] sm:$0x1] %v1270_v36 }
 0x8b8   :  { %v1272_v37 = vld [vmem:[#allocation3] sm:$0xff] }
 0x8b9   :  { %1454 = vmatmul.mubr.msk.f32.vlgmr.msra.gmra.mrb[4].mxu1 %vm49_vm1, %v1272_v37 }
 0x98c   :  { %v1348_v39 = vpop.f32.mrb[4].mxu1 }
 0x98d   :  { %v1349_v41 = vadd.f32 %v1383_v38, %v1348_v39  ;;  %v1455_v42 = vpop.f32.mrb[5].mxu1 }
 0x98f   :  { %1352 = vadd.xlane.f32.xlu1 %v1349_v41  ;;  %v1359_v48 = vmul.f32 %v1385_v40, %v1349_v41 }
 0x991   :  { %1360 = vadd.xlane.f32.xlu0 %v1359_v48 }
 0xa1c   :  { %v1353_v49 = vpop.xlane.xlu1 %1352 }
 0xa1e   :  { %v1361_v50 = vpop.xlane.xlu0 %1360 }
 0xa1f   :  { %v1362_v51 = vsub.f32 %v1353_v49, %v1361_v50 }
 0xa21   :  { %v1363_v52 = vmul.f32 0.25, %v1362_v51 }
 0xa23   :  { %v1364_v53 = vsub.f32 %v1361_v50, %v1363_v52 }
 0xa25   :  { %v1365_v59 = vadd.f32 %v1364_v53, %v1349_v41 }
 0xa27   :  { %1366 = vst [vmem:[%s1825_s3] sm:$0xff] %v1365_v59 }
 0xa28   :  { %1373 = vsyncpa [#allocation5], 1 }
 0xa29   :  { %1374 = vsyncpa [#allocation7], 1 }

</bundles_post_ra>
